<compile_context>
chip_gen: v7x
topology: tpu7x:2x2x1
jax: 0.10.0
libtpu: 0.0.40
codegen_flags: <defaults>
</compile_context>

<pallas_src>
import math

import jax
import jax.numpy as jnp
from jax.experimental import pallas as pl
from jax.experimental.pallas import tpu as pltpu


# ---------------------------------------------------------------------------
# Kernel
# ---------------------------------------------------------------------------
def sage_cv_kernel(a_ref, hdelta_ref, hdst_ref, agg_ref, invdeg_ref,
                   w_ref, b_ref, out_ref, acc_ref):
    """Grid = (dst tiles i [parallel], src/K tiles k [arbitrary, last]).

    a_ref      (tile_dst, tile_src) int8   raw 0/1 adjacency tile
    hdelta_ref (tile_src, F_p)      bf16
    hdst_ref   (tile_dst, F_p)      bf16
    agg_ref    (tile_dst, F_p)      f32
    invdeg_ref (tile_dst, 1)        f32    exact 1/deg (0 for isolated nodes)
    w_ref      (2*F_p, O_p)         bf16   stacked [W_self ; W_neigh]
    b_ref      (1, O_p)             f32
    acc_ref    (tile_dst, F_p)      f32    K-reduction accumulator (scratch)
    """
    k = pl.program_id(1)

    # ---- init accumulator at the start of each K sweep --------------------
    @pl.when(k == 0)
    def _():
        acc_ref[...] = jnp.zeros_like(acc_ref)

    # ---- partial neighbor sum: A_raw tile @ hdelta K-slab (MXU) -----------
    # int8 -> f32 -> bf16 cast is in-VMEM VPU filler on an HBM-bound kernel;
    # 0/1 values are exact in bf16, accumulation stays f32.
    a_bf = a_ref[...].astype(jnp.float32).astype(jnp.bfloat16)
    acc_ref[...] += jnp.dot(a_bf, hdelta_ref[...],
                            preferred_element_type=jnp.float32)

    # ---- finalize on the last K step --------------------------------------
    @pl.when(k == pl.num_programs(1) - 1)
    def _():
        f_p = hdst_ref.shape[-1]
        # mean aggregation: exact f32 1/deg scale (factored out of A)
        h_neigh = agg_ref[...] + acc_ref[...] * invdeg_ref[...]
        # two dots against static slices of the resident stacked weight
        # (no materialized concatenation of [H_dst, h_neigh])
        h = jnp.dot(hdst_ref[...], w_ref[:f_p, :],
                    preferred_element_type=jnp.float32)
        h = h + jnp.dot(h_neigh.astype(jnp.bfloat16), w_ref[f_p:, :],
                        preferred_element_type=jnp.float32)
        h = h + b_ref[...]
        out_ref[...] = jnp.maximum(h, 0.0).astype(out_ref.dtype)


# ---------------------------------------------------------------------------
# Wrapper
# ---------------------------------------------------------------------------
def _round_up(n, m):
    return ((n + m - 1) // m) * m


def _pad2d(x, rows, cols):
    r, c = x.shape
    return jnp.pad(x, ((0, rows - r), (0, cols - c)))


def _pick_vmem_limit():
    """Per-chip scoped-VMEM limit with headroom (v7x: 64 MiB/TC physical)."""
    phys = 128 * 1024 * 1024
    try:
        info = pltpu.get_tpu_info()
        phys = int(getattr(info, "vmem_capacity_bytes", phys))
    except Exception:
        pass
    return int(max(32 * 1024 * 1024,
                   min(phys - 8 * 1024 * 1024, 100 * 1024 * 1024)))


def sage_conv_with_cv(adj, deg, h_src, hbar_src, h_dst, agg_hbar_dst, W, bias,
                      *, tile_dst=512, tile_src=512, feat_tile=128,
                      out_dtype=jnp.float32):
    """Training-branch forward of SAGEConvWithCV.

    adj:           (num_dst, num_src) raw 0/1 adjacency; pass it already as
                   int8 to avoid any wrapper-side cast pass over A.
    deg:           (num_dst,) in-degrees (mean normalization; deg==0 guarded).
    h_src/hbar_src (num_src, in_feats)
    h_dst          (num_dst, in_feats)
    agg_hbar_dst   (num_dst, in_feats)
    W              (out_feats, 2*in_feats)   torch Linear.weight layout
    bias           (out_feats,)
    """
    num_dst, num_src = adj.shape
    in_feats = h_src.shape[1]
    out_feats = W.shape[0]

    f32, bf16, i8 = jnp.float32, jnp.bfloat16, jnp.int8

    # padded (lane-dense) feature sizes; feat_tile=256 fills the v6e/v7x MXU
    # width when in_feats >= 256 (128 is native on v5e)
    F_p = _round_up(in_feats, feat_tile)
    O_p = _round_up(out_feats, 128)

    # --- tile selection ----------------------------------------------------
    d_base = _round_up(num_dst, 128)
    s_base = _round_up(num_src, 128)

    tile_dst = min(tile_dst, d_base)
    # keep >=2 dst tiles whenever possible so the "parallel" axis can shard
    # across v7x's two TensorCores
    if d_base // tile_dst < 2 and d_base >= 256:
        tile_dst = _round_up(d_base // 2, 128)

    tile_src = min(tile_src, s_base)
    # avoid gross zero-padding of the dominant A stream for small src counts
    if s_base % tile_src != 0 and s_base <= 2 * tile_src:
        tile_src = s_base

    D_p = _round_up(num_dst, tile_dst)
    S_p = _round_up(num_src, tile_src)

    # --- operand prep (A stays int8 end-to-end; only an int8 pad remains) ---
    adj_p = _pad2d(adj.astype(i8), D_p, S_p)

    hdelta = (h_src.astype(f32) - hbar_src.astype(f32)).astype(bf16)
    hdelta_p = _pad2d(hdelta, S_p, F_p)
    hdst_p = _pad2d(h_dst.astype(bf16), D_p, F_p)
    agg_p = _pad2d(agg_hbar_dst.astype(f32), D_p, F_p)

    deg_f = deg.astype(f32)
    inv_deg = jnp.where(deg_f > 0, 1.0 / jnp.maximum(deg_f, 1.0), 0.0)
    invdeg_p = _pad2d(inv_deg[:, None], D_p, 1)

    # stacked weight [W_self ; W_neigh] -> (2*F_p, O_p), zero padded, bf16
    w_stacked = jnp.zeros((2 * F_p, O_p), f32)
    w_stacked = w_stacked.at[:in_feats, :out_feats].set(W[:, :in_feats].T)
    w_stacked = w_stacked.at[F_p:F_p + in_feats, :out_feats].set(
        W[:, in_feats:].T)
    w_p = w_stacked.astype(bf16)

    b_p = jnp.zeros((1, O_p), f32).at[0, :out_feats].set(bias.astype(f32))

    grid = (D_p // tile_dst, S_p // tile_src)

    out_p = pl.pallas_call(
        sage_cv_kernel,
        out_shape=jax.ShapeDtypeStruct((D_p, O_p), out_dtype),
        grid_spec=pltpu.PrefetchScalarGridSpec(
            num_scalar_prefetch=0,
            grid=grid,
            in_specs=[
                # raw 0/1 adjacency tile (int8): varies with both grid axes
                pl.BlockSpec((tile_dst, tile_src), lambda i, k: (i, k)),
                # hdelta K-slab: varies only with k
                pl.BlockSpec((tile_src, F_p), lambda i, k: (k, 0)),
                # H_dst tile: varies only with i
                pl.BlockSpec((tile_dst, F_p), lambda i, k: (i, 0)),
                # agg_HBar_dst tile: varies only with i
                pl.BlockSpec((tile_dst, F_p), lambda i, k: (i, 0)),
                # exact 1/deg scale: varies only with i
                pl.BlockSpec((tile_dst, 1), lambda i, k: (i, 0)),
                # stacked weight: constant block -> resident across the grid
                pl.BlockSpec((2 * F_p, O_p), lambda i, k: (0, 0)),
                # bias: constant block -> resident across the grid
                pl.BlockSpec((1, O_p), lambda i, k: (0, 0)),
            ],
            # same output block across the K axis -> accumulator pattern
            out_specs=pl.BlockSpec((tile_dst, O_p), lambda i, k: (i, 0)),
            scratch_shapes=[pltpu.VMEM((tile_dst, F_p), f32)],
        ),
        compiler_params=pltpu.CompilerParams(
            dimension_semantics=("parallel", "arbitrary"),
            vmem_limit_bytes=_pick_vmem_limit(),
        ),
    )(adj_p, hdelta_p, hdst_p, agg_p, invdeg_p, w_p, b_p)

    return out_p[:num_dst, :out_feats]


# ---------------------------------------------------------------------------
# Demo / correctness check
# ---------------------------------------------------------------------------
def _xavier_uniform(key, shape, gain):
    # shape = (out_feats, fan_in) like torch Linear.weight
    fan_out, fan_in = shape
    bound = gain * math.sqrt(6.0 / (fan_in + fan_out))
    return jax.random.uniform(key, shape, jnp.float32, -bound, bound)


if __name__ == "__main__":
    in_feats = 32
    out_feats = 32
    num_src = 600   # source nodes of the block
    num_dst = 200   # destination nodes (pads to 256 -> 2 parallel dst tiles)

    root = jax.random.PRNGKey(0)
    k_adj, k_hsrc, k_hbar, k_agg, k_w = jax.random.split(root, 5)

    # deterministic graph block: random edges, every dst has >=1 in-neighbor
    edge_probs = jax.random.uniform(k_adj, (num_dst, num_src))
    adj_f = (edge_probs > 0.9).astype(jnp.float32)
    adj_f = jnp.maximum(adj_f, jnp.eye(num_dst, num_src, dtype=jnp.float32))
    deg = jnp.sum(adj_f, axis=1)            # in-degrees
    adj_i8 = adj_f.astype(jnp.int8)         # raw 0/1 already in kernel dtype

    # node features
    h_src = jax.random.normal(k_hsrc, (num_src, in_feats), jnp.float32)
    hbar_src = jax.random.normal(k_hbar, (num_src, in_feats), jnp.float32)
    h_dst = h_src[:num_dst]                 # DGL: dst nodes are a prefix of src
    agg_hbar_dst = jax.random.normal(k_agg, (num_dst, in_feats), jnp.float32)

    # parameters: xavier_uniform(relu gain), zero bias (as in reset_parameters)
    gain = math.sqrt(2.0)
    W = _xavier_uniform(k_w, (out_feats, in_feats * 2), gain)
    bias = jnp.zeros((out_feats,), jnp.float32)

    out = sage_conv_with_cv(adj_i8, deg, h_src, hbar_src, h_dst, agg_hbar_dst,
                            W, bias)
    out = jax.block_until_ready(out)
    assert out.shape == (num_dst, out_feats)

    # reference mirroring the kernel's bf16 MXU-operand casts (f32 accumulate,
    # exact f32 1/deg normalization)
    f32, bf16 = jnp.float32, jnp.bfloat16
    hdelta_bf = (h_src - hbar_src).astype(bf16).astype(f32)
    hdst_bf = h_dst.astype(bf16).astype(f32)
    W_bf = W.astype(bf16).astype(f32)
    inv_deg = jnp.where(deg > 0, 1.0 / jnp.maximum(deg, 1.0), 0.0)
    hdelta_new = (adj_f @ hdelta_bf) * inv_deg[:, None]
    h_neigh = agg_hbar_dst + hdelta_new
    x = jnp.concatenate([hdst_bf, h_neigh.astype(bf16).astype(f32)], axis=1)
    ref = jnp.maximum(x @ W_bf.T + bias, 0.0)

    assert jnp.allclose(out, ref, atol=5e-2, rtol=5e-2), (
        float(jnp.max(jnp.abs(out - ref))))

    print("KERNEL_OK")
</pallas_src>

<mosaic_0001>
module attributes {stable_mosaic.version = 11 : i64} {
  func.func @sage_cv_kernel(%arg0: i32, %arg1: i32, %arg2: memref<128x640xi8, #tpu.memory_space<vmem>>, %arg3: memref<640x128xbf16, #tpu.memory_space<vmem>>, %arg4: memref<128x128xbf16, #tpu.memory_space<vmem>>, %arg5: memref<128x128xf32, #tpu.memory_space<vmem>>, %arg6: memref<128x1xf32, #tpu.memory_space<vmem>>, %arg7: memref<256x128xbf16, #tpu.memory_space<vmem>>, %arg8: memref<1x128xf32, #tpu.memory_space<vmem>>, %arg9: memref<128x128xf32, #tpu.memory_space<vmem>>, %arg10: memref<128x128xf32, #tpu.memory_space<vmem>>) attributes {dimension_semantics = [#tpu.dimension_semantics<parallel>, #tpu.dimension_semantics<arbitrary>], iteration_bounds = array<i64: 2, 1>, scalar_prefetch = 0 : i64, scratch_operands = 1 : i64, tpu.core_type = #tpu.core_type<tc>, window_params = [{transform_indices = @transform_0, window_bounds = array<i64: 128, 640>}, {transform_indices = @transform_1, window_bounds = array<i64: 640, 128>}, {transform_indices = @transform_2, window_bounds = array<i64: 128, 128>}, {transform_indices = @transform_3, window_bounds = array<i64: 128, 128>}, {transform_indices = @transform_4, window_bounds = array<i64: 128, 1>}, {pipeline_mode = #tpu.pipeline_mode<synchronous>, transform_indices = @transform_5, window_bounds = array<i64: 256, 128>}, {pipeline_mode = #tpu.pipeline_mode<synchronous>, transform_indices = @transform_6, window_bounds = array<i64: 1, 128>}, {transform_indices = @transform_7, window_bounds = array<i64: 128, 128>}]} {
    %c0_i32 = arith.constant 0 : i32
    %0 = arith.cmpi eq, %arg1, %c0_i32 : i32
    %1 = arith.extui %0 : i1 to i32
    %c0_i32_0 = arith.constant 0 : i32
    %2 = arith.cmpi ne, %1, %c0_i32_0 : i32
    scf.if %2 {
      %cst_10 = arith.constant 0.000000e+00 : f32
      %14 = vector.broadcast %cst_10 : f32 to vector<128x128xf32>
      %c0_11 = arith.constant 0 : index
      %c0_12 = arith.constant 0 : index
      %15 = vector.load %arg10[%c0_11, %c0_12] : memref<128x128xf32, #tpu.memory_space<vmem>>, vector<128x128xf32>
      tpu.vector_store %arg10[%c0_11, %c0_12], %14 {strides = array<i32>} : memref<128x128xf32, #tpu.memory_space<vmem>>, vector<128x128xf32>,
    } else {
    }
    %c0 = arith.constant 0 : index
    %c0_1 = arith.constant 0 : index
    %3 = vector.load %arg2[%c0, %c0_1] : memref<128x640xi8, #tpu.memory_space<vmem>>, vector<128x640xi8>
    %4 = arith.sitofp %3 : vector<128x640xi8> to vector<128x640xf32>
    %5 = arith.truncf %4 : vector<128x640xf32> to vector<128x640xbf16>
    %c0_2 = arith.constant 0 : index
    %c0_3 = arith.constant 0 : index
    %6 = vector.load %arg10[%c0_2, %c0_3] : memref<128x128xf32, #tpu.memory_space<vmem>>, vector<128x128xf32>
    %c0_4 = arith.constant 0 : index
    %c0_5 = arith.constant 0 : index
    %7 = vector.load %arg3[%c0_4, %c0_5] : memref<640x128xbf16, #tpu.memory_space<vmem>>, vector<640x128xbf16>
    %cst = arith.constant dense<0.000000e+00> : vector<128x128xf32>
    %8 = tpu.matmul %5, %7, %cst {dimension_numbers = #tpu.dot_dimension_numbers<[1], [0], [0], [1], [0, 0, 1, 1], [], []>} : vector<128x640xbf16>, vector<640x128xbf16>, vector<128x128xf32> -> vector<128x128xf32>
    %9 = arith.addf %6, %8 : vector<128x128xf32>
    %c0_6 = arith.constant 0 : index
    %c0_7 = arith.constant 0 : index
    %10 = vector.load %arg10[%c0_6, %c0_7] : memref<128x128xf32, #tpu.memory_space<vmem>>, vector<128x128xf32>
    tpu.vector_store %arg10[%c0_6, %c0_7], %9 {strides = array<i32>} : memref<128x128xf32, #tpu.memory_space<vmem>>, vector<128x128xf32>,
    %c0_i32_8 = arith.constant 0 : i32
    %11 = arith.cmpi eq, %arg1, %c0_i32_8 : i32
    %12 = arith.extui %11 : i1 to i32
    %c0_i32_9 = arith.constant 0 : i32
    %13 = arith.cmpi ne, %12, %c0_i32_9 : i32
    scf.if %13 {
      %c0_10 = arith.constant 0 : index
      %c0_11 = arith.constant 0 : index
      %14 = vector.load %arg5[%c0_10, %c0_11] : memref<128x128xf32, #tpu.memory_space<vmem>>, vector<128x128xf32>
      %c0_12 = arith.constant 0 : index
      %c0_13 = arith.constant 0 : index
      %15 = vector.load %arg10[%c0_12, %c0_13] : memref<128x128xf32, #tpu.memory_space<vmem>>, vector<128x128xf32>
      %c0_14 = arith.constant 0 : index
      %c0_15 = arith.constant 0 : index
      %16 = vector.load %arg6[%c0_14, %c0_15] : memref<128x1xf32, #tpu.memory_space<vmem>>, vector<128x1xf32>
      %17 = vector.broadcast %16 : vector<128x1xf32> to vector<128x128xf32>
      %18 = arith.mulf %15, %17 : vector<128x128xf32>
      %19 = arith.addf %14, %18 : vector<128x128xf32>
      %c0_16 = arith.constant 0 : index
      %c0_17 = arith.constant 0 : index
      %20 = vector.load %arg4[%c0_16, %c0_17] : memref<128x128xbf16, #tpu.memory_space<vmem>>, vector<128x128xbf16>
      %c0_18 = arith.constant 0 : index
      %c0_19 = arith.constant 0 : index
      %21 = vector.load %arg7[%c0_18, %c0_19] : memref<256x128xbf16, #tpu.memory_space<vmem>>, vector<128x128xbf16>
      %cst_20 = arith.constant dense<0.000000e+00> : vector<128x128xf32>
      %22 = tpu.matmul %20, %21, %cst_20 {dimension_numbers = #tpu.dot_dimension_numbers<[1], [0], [0], [1], [0, 0, 1, 1], [], []>} : vector<128x128xbf16>, vector<128x128xbf16>, vector<128x128xf32> -> vector<128x128xf32>
      %23 = arith.truncf %19 : vector<128x128xf32> to vector<128x128xbf16>
      %c128 = arith.constant 128 : index
      %c0_21 = arith.constant 0 : index
      %24 = vector.load %arg7[%c128, %c0_21] : memref<256x128xbf16, #tpu.memory_space<vmem>>, vector<128x128xbf16>
      %cst_22 = arith.constant dense<0.000000e+00> : vector<128x128xf32>
      %25 = tpu.matmul %23, %24, %cst_22 {dimension_numbers = #tpu.dot_dimension_numbers<[1], [0], [0], [1], [0, 0, 1, 1], [], []>} : vector<128x128xbf16>, vector<128x128xbf16>, vector<128x128xf32> -> vector<128x128xf32>
      %26 = arith.addf %22, %25 : vector<128x128xf32>
      %c0_23 = arith.constant 0 : index
      %c0_24 = arith.constant 0 : index
      %27 = vector.load %arg8[%c0_23, %c0_24] : memref<1x128xf32, #tpu.memory_space<vmem>>, vector<1x128xf32>
      %28 = vector.broadcast %27 : vector<1x128xf32> to vector<128x128xf32>
      %29 = arith.addf %26, %28 : vector<128x128xf32>
      %cst_25 = arith.constant 0.000000e+00 : f32
      %30 = vector.broadcast %cst_25 : f32 to vector<128x128xf32>
      %31 = arith.maximumf %29, %30 : vector<128x128xf32>
      %c0_26 = arith.constant 0 : index
      %c0_27 = arith.constant 0 : index
      %32 = vector.load %arg9[%c0_26, %c0_27] : memref<128x128xf32, #tpu.memory_space<vmem>>, vector<128x128xf32>
      tpu.vector_store %arg9[%c0_26, %c0_27], %31 {strides = array<i32>} : memref<128x128xf32, #tpu.memory_space<vmem>>, vector<128x128xf32>,
    } else {
    }
    return
  }
  func.func @transform_0(%arg0: i32, %arg1: i32) -> (i32, i32) {
    %c0_i32 = arith.constant 0 : i32
    return %arg0, %arg1 : i32, i32
  }
  func.func @transform_1(%arg0: i32, %arg1: i32) -> (i32, i32) {
    %c0_i32 = arith.constant 0 : i32
    %c0_i32_0 = arith.constant 0 : i32
    return %arg1, %c0_i32 : i32, i32
  }
  func.func @transform_2(%arg0: i32, %arg1: i32) -> (i32, i32) {
    %c0_i32 = arith.constant 0 : i32
    %c0_i32_0 = arith.constant 0 : i32
    return %arg0, %c0_i32 : i32, i32
  }
  func.func @transform_3(%arg0: i32, %arg1: i32) -> (i32, i32) {
    %c0_i32 = arith.constant 0 : i32
    %c0_i32_0 = arith.constant 0 : i32
    return %arg0, %c0_i32 : i32, i32
  }
  func.func @transform_4(%arg0: i32, %arg1: i32) -> (i32, i32) {
    %c0_i32 = arith.constant 0 : i32
    %c0_i32_0 = arith.constant 0 : i32
    return %arg0, %c0_i32 : i32, i32
  }
  func.func @transform_5(%arg0: i32, %arg1: i32) -> (i32, i32) {
    %c0_i32 = arith.constant 0 : i32
    %c0_i32_0 = arith.constant 0 : i32
    %c0_i32_1 = arith.constant 0 : i32
    return %c0_i32, %c0_i32_0 : i32, i32
  }
  func.func @transform_6(%arg0: i32, %arg1: i32) -> (i32, i32) {
    %c0_i32 = arith.constant 0 : i32
    %c0_i32_0 = arith.constant 0 : i32
    %c0_i32_1 = arith.constant 0 : i32
    return %c0_i32, %c0_i32_0 : i32, i32
  }
  func.func @transform_7(%arg0: i32, %arg1: i32) -> (i32, i32) {
    %c0_i32 = arith.constant 0 : i32
    %c0_i32_0 = arith.constant 0 : i32
    return %arg0, %c0_i32 : i32, i32
  }
}

</mosaic_0001>

<bundles_post_ra>
// kernel: tpu_custom_call.1
= control target key start
LH: loop header
LB: loop body
LE: loop exit
PB: predicated region body
PF: predicated region fallthrough
CT: control target
= control target key end

     0   :  { %s3587_s0 = inlined_call_operand.hbm [shape: s8[256,640], index: 0, kind: input, shape index: {}]   ;;  %s3588_s1 = inlined_call_operand.hbm [shape: bf16[640,128], index: 1, kind: input, shape index: {}]   ;;  %s3589_s2 = inlined_call_operand.hbm [shape: bf16[256,128], index: 2, kind: input, shape index: {}]   ;;  %s3590_s3 = inlined_call_operand.hbm [shape: f32[256,128], index: 3, kind: input, shape index: {}]   ;;  %s3591_s4 = inlined_call_operand.hbm [shape: f32[256,1], index: 4, kind: input, shape index: {}]   ;;  %s3592_s5 = inlined_call_operand.hbm [shape: bf16[256,128], index: 5, kind: input, shape index: {}]   ;;  %s3593_s6 = inlined_call_operand.hbm [shape: f32[1,128], index: 6, kind: input, shape index: {}]   ;;  %s3594_s7 = inlined_call_operand.hbm [shape: f32[256,128], index: 7, kind: output, shape index: {}]  }
   0x1   :  { %3620 = sst [smem:[#allocation28_spill]] %s3587_s0 }
   0x2   :  { %3621 = sst [smem:[#allocation29_spill]] %s3588_s1 }
   0x3   :  { %3622 = sst [smem:[#allocation30_spill]] %s3589_s2 }
   0x4   :  { %3623 = sst [smem:[#allocation31_spill]] %s3590_s3 }
   0x5   :  { %3624 = sst [smem:[#allocation32_spill]] %s3594_s7 }
   0x6   :  { %12 = vsyncpa [#allocation4], 0 }
   0x7   :  { %14 = vsyncpa [#allocation4 + $0x1], 0 }
   0x8   :  { %15 = vsyncpa [#allocation7], 0 }
   0x9   :  { %16 = vsyncpa [#allocation13], 0 }
   0xa   :  { %17 = vsyncpa [#allocation5], 0 }
   0xb   :  { %19 = vsyncpa [#allocation5 + $0x1], 0  ;;  %s2975_s24 = smov 0   ;;  %s2977_s25 = smov 0  }
   0xc   :  { %s2979_s26 = smov 0   ;;  %s2981_s27 = smov 0  }
   0xd   :  { %s2983_s28 = smov 0   ;;  %s2985_s29 = smov 0  }
   0xe LB: > { %3625 = sst [smem:[#allocation21_spill]] %s2896_s24  ;;  %s37_s30 = sadd.s32 1, %s2912_s28  ;;  %s2916_s29 = sphi %s2985_s29, %s25_s29   ;;  %s2912_s28 = sphi %s2983_s28, %s3674_s28   ;;  %s2908_s27 = sphi %s2981_s27, %s3673_s27   ;;  %s2904_s26 = sphi %s2979_s26, %s3669_s26   ;;  %s2900_s25 = sphi %s2977_s25, %s3672_s25   ;;  %s2896_s24 = sphi %s2975_s24, %s3671_s24  }
   0xf   : > { %3626 = sst [smem:[#allocation22_spill]] %s2904_s26  ;;  %s46_s8 = sadd.s32 1, %s2904_s26 }
  0x10   : > { %3627 = sst [smem:[#allocation23_spill]] %s2916_s29  ;;  %p39_p0 = scmp.ge.s32.totalorder %s37_s30, 2 }
  0x11   : > { %p3595_p1 = scmp.ne.s32.totalorder %s2904_s26, %s2900_s25  ;;  %p54_p2 = scmp.eq.s32.totalorder %s2916_s29, 0 }
  0x12   : > { %s3676_s30 = smov (%p39_p0, %s37_s30), 0  ;;  %p2483_p5 = scmp.lt.s32.totalorder %s2916_s29, 2 }
  0x13   : > { %3628 = sst [smem:[#allocation24_spill]] %s3676_s30  ;;  %p55_p4 = por %p54_p2, %p3595_p1 }
  0x14   : > { %s41_s9 = ssub.s32 %s2912_s28, %s3676_s30  ;;  %s295_s10 = sand.u32 1, %s2916_s29  }
  0x15   : > { %p44_p6 = scmp.eq.s32.totalorder %s41_s9, 0  ;;  %s3021_s11 = sand.u32 1, %s2904_s26  }
  0x16   : > { %s2429_s12 = smul.u32 2560, %s2912_s28  ;;  %s3630_s0 = sld [smem:[#allocation28_spill]] }
  0x17   : > { %s3025_s13 = scalar_select %p44_p6, %s2904_s26, %s46_s8  }
  0x18   : > { %s2428_s14 = smul.u32 160, %s3021_s11  ;;  %p3033_p7 = pnand %p2483_p5, %p55_p4 }
  0x19   : > { %3629 = sst [smem:[#allocation25_spill]] %s3025_s13  ;;  %s3039_s21 = scalar_lea.sflag [#allocation4], %s295_s10 }
  0x1a   : > { %s3631_s18 = scalar_select %p3033_p7, 1, 0 }
  0x1b   : > { %s299_s19 = scalar_lea.vmem [#allocation3], %s2428_s14  ;;  %p3045_p9 = pneg %p3033_p7 }
  0x1c   : > { %s3031_s17 = scalar_lea.hbm %s3630_s0, %s2429_s12  ;;  %s309_s20 = sshll.u32 %s299_s19, 4  ;;  %s3037_s20 = int_to_ptr.vmem [resolvable:$true] %s309_s20 }
  0x1d   : > { %s2614_s22 = scalar_lea.hbm %s3031_s17, 2560  ;;  %s2619_s12 = scalar_lea.hbm %s3630_s0, 5120 }
  0x1e   : > { %p2615_p8 = scmp.ne.s32.totalorder %s3031_s17, %s2614_s22  ;;  %p2620_p12 = scmp.lt.u32.totalorder %s3031_s17, %s3630_s0 }
  0x1f   : > { %p2621_p13 = scmp.lt.u32.totalorder %s2619_s12, %s2614_s22  ;;  %p2623_p2 = scmp.lt.u32.totalorder %s2614_s22, %s3031_s17 }
  0x20   : > { %p2617_p10 = pnand %p3045_p9, %p2615_p8 }
  0x21   : > { %p2622_p0 = por %p2621_p13, %p2620_p12 }
  0x22   : > { %p2618_p11 = pneg %p2617_p10 }
  0x23   : > { %p2624_p4 = por %p2623_p2, %p2622_p0 }
  0x25   : > { %p2625_p5 = pnand %p2624_p4, %p2618_p11 }
  0x27   : > { %2628 = shalt.err (!%p2625_p5)
}
  0x28   : > { %s2629_s10 = scalar_lea.vmem %s3037_s20, 2560  ;;  %s2918_s16 = smov [#allocation3]  }
  0x29   : > { %p2630_p6 = scmp.ne.s32.totalorder %s3037_s20, %s2629_s10  ;;  %s2634_s19 = sshll.u32 %s2918_s16, 4  ;;  %s2635_s19 = int_to_ptr.vmem [resolvable:$false] %s2634_s19 }
  0x2a   : > { %s2636_s8 = scalar_lea.vmem %s2635_s19, 5120  ;;  %p2637_p3 = scmp.lt.s32.totalorder %s3037_s20, %s2635_s19 }
  0x2b   : > { %p2632_p8 = pnand %p2630_p6, %p3045_p9  ;;  %p2638_p1 = scmp.lt.s32.totalorder %s2636_s8, %s2629_s10 }
  0x2d   : > { %p2633_p10 = pneg %p2632_p8  ;;  %p2639_p12 = por %p2638_p1, %p2637_p3 }
  0x2f   : > { %p2640_p13 = pnand %p2639_p12, %p2633_p10 }
  0x31   : > { %2643 = shalt.err (!%p2640_p13)
}
  0x32   : > { %s2919_s22 = smov 640   ;;  %s2920_s9 = smov 40  }
  0x33   : > { %2466 = dma.hbm_to_vmem [thread:$0]  (!%p3033_p7), %s3031_s17, 2560, %s3037_s20, %s3039_s21, %s2919_s22, %s2919_s22, %s2920_s9  }
  0x34   : > { %s2033_s12 = sshll.u32 %s3021_s11, 6  ;;  %s2120_s14 = sshll.u32 %s2912_s28, 10 }
  0x35   : > { %s3633_s2 = sld [smem:[#allocation30_spill]]  ;;  %s323_s19 = scalar_lea.vmem [#allocation8], %s2033_s12 }
  0x36   : > { %s330_s8 = sshll.u32 %s323_s19, 4  ;;  %s3076_s8 = int_to_ptr.vmem [resolvable:$true] %s330_s8 }
  0x3b   : > { %s3074_s10 = scalar_lea.hbm %s3633_s2, %s2120_s14  ;;  %s2649_s22 = scalar_lea.hbm %s3633_s2, 2048 }
  0x3c   : > { %s2644_s0 = scalar_lea.hbm %s3074_s10, 1024  ;;  %p2650_p0 = scmp.lt.u32.totalorder %s3074_s10, %s3633_s2 }
  0x3d   : > { %p2645_p1 = scmp.ne.s32.totalorder %s3074_s10, %s2644_s0  ;;  %p2651_p2 = scmp.lt.u32.totalorder %s2649_s22, %s2644_s0 }
  0x3e   : > { %p2653_p5 = scmp.lt.u32.totalorder %s2644_s0, %s3074_s10 }
  0x3f   : > { %p2647_p3 = pnand %p2645_p1, %p3045_p9  ;;  %p2652_p4 = por %p2651_p2, %p2650_p0 }
  0x41   : > { %p2648_p11 = pneg %p2647_p3  ;;  %p2654_p6 = por %p2653_p5, %p2652_p4 }
  0x43   : > { %p2655_p8 = pnand %p2654_p6, %p2648_p11 }
  0x45   : > { %2658 = shalt.err (!%p2655_p8)
}
  0x46   : > { %s2659_s12 = scalar_lea.vmem %s3076_s8, 1024  ;;  %s2921_s15 = smov [#allocation8]  }
  0x47   : > { %p2660_p10 = scmp.ne.s32.totalorder %s3076_s8, %s2659_s12  ;;  %s2664_s16 = sshll.u32 %s2921_s15, 4  ;;  %s2665_s16 = int_to_ptr.vmem [resolvable:$false] %s2664_s16 }
  0x48   : > { %s2666_s19 = scalar_lea.vmem %s2665_s16, 2048  ;;  %p2667_p1 = scmp.lt.s32.totalorder %s3076_s8, %s2665_s16 }
  0x49   : > { %p2662_p12 = pnand %p2660_p10, %p3045_p9  ;;  %p2668_p3 = scmp.lt.s32.totalorder %s2666_s19, %s2659_s12 }
  0x4b   : > { %p2663_p13 = pneg %p2662_p12  ;;  %p2669_p0 = por %p2668_p3, %p2667_p1 }
  0x4d   : > { %p2670_p2 = pnand %p2669_p0, %p2663_p13 }
  0x4f   : > { %2673 = shalt.err (!%p2670_p2)
}
  0x50   : > { %s3596_s0 = smov 64   ;;  %s3598_s17 = smov 4  }
  0x51   : > { %2469 = dma.hbm_to_vmem [thread:$0]  (!%p3033_p7), %s3074_s10, 1024, %s3076_s8, %s3039_s21, %s3596_s0, %s3596_s0, %s3598_s17  }
  0x52   : > { %s3104_s20 = sadd.s32 4294967295, %s2916_s29   ;;  %s2024_s22 = sadd.s32 4294967294, %s2916_s29  }
  0x53   : > { %p59_p11 = scmp.ne.s32.totalorder %s2900_s25, %s2896_s24  ;;  %p3606_p4 = scmp.eq.s32.totalorder %s3104_s20, 0 }
  0x54   : > { %p229_p5 = scmp.eq.s32.totalorder %s3104_s20, 1  ;;  %p235_p6 = scmp.eq.s32.totalorder %s2024_s22, 1 }
  0x55   : > { %p2025_p8 = scmp.ge.s32.totalorder %s2916_s29, 1  ;;  %p3114_p10 = por %p3606_p4, %p59_p11 }
  0x56   : > { %p3635_p12 = scmp.ne.s32.totalorder %s2904_s26, %s2900_s25  ;;  %p3125_p1 = por %p235_p6, %p59_p11 }
  0x57   : > { %s3634_s9 = scalar_select %p3114_p10, 1, 0 }
  0x58   : > { %p3121_p13 = por %p229_p5, %p3635_p12  ;;  %p242_p3 = scmp.lt.s32.totalorder %s2916_s29, 3 }
  0x59   : > { %s3638_s8 = scalar_select %p3125_p1, 1, 0 }
  0x5a   : > { %s3636_s10 = scalar_select %p3121_p13, 1, 0 }
  0x5b   : > { %3639 = sst [smem:[#allocation27_spill]] %s3638_s8  ;;  %p3130_p0 = pnand %p2025_p8, %p242_p3 }
  0x5c   : > { %3637 = sst [smem:[#allocation26_spill]] %s3636_s10  ;;  %s2924_s12 = smov [#allocation6]  }
  0x5d   : > { %s3640_s14 = scalar_select %p3130_p0, 1, 0 }
  0x5e   : > { %s257_s15 = sshll.u32 %s2924_s12, 4  ;;  %s3604_s16 = sshll.u32 %s3021_s11, 7  ;;  %s3134_s15 = int_to_ptr.vmem [resolvable:$true] %s257_s15 }
  0x5f   : > { %p2453_p2 = pneg %p3130_p0  ;;  %s3610_s19 = sshll.u32 %s2912_s28, 11 }
  0x60   : > { %s344_s22 = scalar_lea.vmem [#allocation9], %s3604_s16  ;;  %s3642_s3 = sld [smem:[#allocation31_spill]] }
  0x61   : > { %s351_s0 = sshll.u32 %s344_s22, 4  ;;  %p3144_p11 = pnand %p2453_p2, %p3606_p4  ;;  %s3155_s0 = int_to_ptr.vmem [resolvable:$true] %s351_s0 }
  0x62   : > { %s3643_s1 = sld [smem:[#allocation29_spill]] }
  0x63   : > { %s3641_s17 = scalar_select %p3144_p11, 1, 0 }
  0x64   : > { %p3165_p6 = pneg %p3144_p11 }
  0x66   : > { %s3153_s12 = scalar_lea.hbm %s3642_s3, %s3610_s19 }
  0x67   : > { %s3644_s8 = scalar_select %p3165_p6, 1, 0 }
  0x68   : > { %s2674_s29 = scalar_lea.hbm %s3643_s1, 5120 }
  0x69   : > { %p2675_p5 = scmp.ne.s32.totalorder %s3643_s1, %s2674_s29  ;;  %p2681_p3 = scmp.lt.u32.totalorder %s2674_s29, %s3643_s1 }
  0x6b   : > { %p2677_p8 = pnand %p3165_p6, %p2675_p5 }
  0x6d   : > { %p2678_p12 = pneg %p2677_p8 }
  0x6f   : > { %p2683_p2 = pnand %p2681_p3, %p2678_p12 }
  0x71   : > { %2686 = shalt.err (!%p2683_p2)
}
  0x72   : > { %s2687_s26 = scalar_lea.vmem %s3134_s15, 5120  ;;  %p2695_p10 = scmp.lt.s32.totalorder %s3134_s15, %s3134_s15 }
  0x73   : > { %p2688_p4 = scmp.ne.s32.totalorder %s3134_s15, %s2687_s26  ;;  %p2696_p0 = scmp.lt.s32.totalorder %s2687_s26, %s2687_s26 }
  0x75   : > { %p2690_p1 = pnand %p2688_p4, %p3165_p6  ;;  %p2697_p5 = por %p2696_p0, %p2695_p10 }
  0x77   : > { %p2691_p13 = pneg %p2690_p1 }
  0x79   : > { %p2698_p8 = pnand %p2697_p5, %p2691_p13 }
  0x7b   : > { %2701 = shalt.err (!%p2698_p8)
}
  0x7c   : > { %s3645_s29 = smov 4   ;;  %s3646_s13 = smov 64  }
  0x7d   : > { %2456 = dma.hbm_to_vmem [thread:$0]  (!%p3144_p11), %s3643_s1, 5120, %s3134_s15, [#allocation7], %s3646_s13, %s3646_s13, %s3645_s29  }
  0x7e   : > { %s2702_s2 = scalar_lea.hbm %s3153_s12, 2048  ;;  %s2707_s19 = scalar_lea.hbm %s3642_s3, 4096 }
  0x7f   : > { %p2703_p4 = scmp.ne.s32.totalorder %s3153_s12, %s2702_s2  ;;  %p2708_p1 = scmp.lt.u32.totalorder %s3153_s12, %s3642_s3 }
  0x80   : > { %p2709_p0 = scmp.lt.u32.totalorder %s2707_s19, %s2702_s2  ;;  %p2711_p3 = scmp.lt.u32.totalorder %s2702_s2, %s3153_s12 }
  0x81   : > { %p2705_p10 = pnand %p2703_p4, %p3045_p9 }
  0x82   : > { %p2710_p12 = por %p2709_p0, %p2708_p1 }
  0x83   : > { %p2706_p13 = pneg %p2705_p10 }
  0x84   : > { %p2712_p2 = por %p2711_p3, %p2710_p12 }
  0x86   : > { %p2713_p5 = pnand %p2712_p2, %p2706_p13 }
  0x88   : > { %2716 = shalt.err (!%p2713_p5)
}
  0x89   : > { %s2717_s15 = scalar_lea.vmem %s3155_s0, 2048  ;;  %s2925_s16 = smov [#allocation9]  }
  0x8a   : > { %p2718_p8 = scmp.ne.s32.totalorder %s3155_s0, %s2717_s15  ;;  %s2722_s22 = sshll.u32 %s2925_s16, 4  ;;  %s2723_s22 = int_to_ptr.vmem [resolvable:$false] %s2722_s22 }
  0x8b   : > { %s2724_s7 = scalar_lea.vmem %s2723_s22, 4096  ;;  %p2725_p11 = scmp.lt.s32.totalorder %s3155_s0, %s2723_s22 }
  0x8c   : > { %p2720_p4 = pnand %p2718_p8, %p3045_p9  ;;  %p2726_p6 = scmp.lt.s32.totalorder %s2724_s7, %s2717_s15 }
  0x8e   : > { %p2721_p10 = pneg %p2720_p4  ;;  %p2727_p1 = por %p2726_p6, %p2725_p11 }
  0x90   : > { %p2728_p0 = pnand %p2727_p1, %p2721_p10 }
  0x92   : > { %2731 = shalt.err (!%p2728_p0)
}
  0x93   : > { %s2926_s24 = smov 128   ;;  %s2927_s19 = smov 8  }
  0x94   : > { %2472 = dma.hbm_to_vmem [thread:$0]  (!%p3033_p7), %s3153_s12, 2048, %s3155_s0, %s3039_s21, %s2926_s24, %s2926_s24, %s2927_s19  }
  0x95   : > { %s2928_s2 = smov [#allocation11]   ;;  %s2929_s26 = smov [#allocation12]  }
  0x96   : > { %s270_s30 = sshll.u32 %s2928_s2, 4  ;;  %s284_s16 = sshll.u32 %s2929_s26, 4  ;;  %s271_s30 = int_to_ptr.vmem [resolvable:$true] %s270_s30  ;;  %s3214_s16 = int_to_ptr.vmem [resolvable:$true] %s284_s16 }
  0x97   : > { %s2732_s7 = scalar_lea.hbm %s3592_s5, 2048  ;;  %p3647_p6 = scmp.ne.s32.totalorder %s3644_s8, 0 }
  0x98   : > { %p2733_p11 = scmp.ne.s32.totalorder %s3592_s5, %s2732_s7  ;;  %p2739_p3 = scmp.lt.u32.totalorder %s2732_s7, %s3592_s5 }
  0x9a   : > { %p2735_p13 = pnand %p2733_p11, %p3647_p6 }
  0x9c   : > { %p2736_p12 = pneg %p2735_p13 }
  0x9e   : > { %p2741_p2 = pnand %p2739_p3, %p2736_p12 }
  0xa0   : > { %2744 = shalt.err (!%p2741_p2)
}
  0xa1   : > { %s2745_s12 = scalar_lea.vmem %s271_s30, 2048  ;;  %p2753_p10 = scmp.lt.s32.totalorder %s271_s30, %s271_s30 }
  0xa2   : > { %p2746_p5 = scmp.ne.s32.totalorder %s271_s30, %s2745_s12  ;;  %p2754_p1 = scmp.lt.s32.totalorder %s2745_s12, %s2745_s12 }
  0xa4   : > { %p2748_p8 = pnand %p2746_p5, %p3647_p6  ;;  %p2755_p0 = por %p2754_p1, %p2753_p10 }
  0xa6   : > { %p2749_p4 = pneg %p2748_p8 }
  0xa8   : > { %p2756_p7 = pnand %p2755_p0, %p2749_p4 }
  0xaa   : > { %2759 = shalt.err (!%p2756_p7)
}
  0xab   : > { %p3648_p11 = scmp.ne.s32.totalorder %s3641_s17, 0  ;;  %s2760_s26 = scalar_lea.hbm %s3593_s6, 16 }
  0xac   : > { %p2761_p13 = scmp.ne.s32.totalorder %s3593_s6, %s2760_s26  ;;  %p2767_p3 = scmp.lt.u32.totalorder %s2760_s26, %s3593_s6 }
  0xad   : > { %2459 = dma.hbm_to_vmem [thread:$0]  (!%p3648_p11), %s3592_s5, 2048, %s271_s30, [#allocation7], %s3646_s13, %s3646_s13, %s3645_s29  }
  0xae   : > { %p2763_p7 = pnand %p2761_p13, %p3647_p6 }
  0xb0   : > { %p2764_p12 = pneg %p2763_p7 }
  0xb2   : > { %p2769_p2 = pnand %p2767_p3, %p2764_p12 }
  0xb4   : > { %2772 = shalt.err (!%p2769_p2)
}
  0xb5   : > { %s2773_s29 = scalar_lea.vmem %s3214_s16, 16  ;;  %s2780_s13 = scalar_lea.vmem %s3214_s16, 32 }
  0xb6   : > { %p2774_p5 = scmp.ne.s32.totalorder %s3214_s16, %s2773_s29  ;;  %p2781_p10 = scmp.lt.s32.totalorder %s3214_s16, %s3214_s16 }
  0xb7   : > { %p2782_p1 = scmp.lt.s32.totalorder %s2780_s13, %s2773_s29 }
  0xb8   : > { %p2776_p8 = pnand %p2774_p5, %p3647_p6 }
  0xb9   : > { %p2783_p0 = por %p2782_p1, %p2781_p10 }
  0xba   : > { %p2777_p4 = pneg %p2776_p8 }
  0xbc   : > { %p2784_p13 = pnand %p2783_p0, %p2777_p4 }
  0xbe   : > { %2787 = shalt.err (!%p2784_p13)
}
  0xbf   : > { %2462 = dma.hbm_to_vmem [thread:$0]  (!%p3648_p11), %s3593_s6, 16, %s3214_s16, [#allocation13]  }
  0xc0   : > { %s3649_s8 = sshll.u32 %s2912_s28, 11  ;;  %s3650_s2 = sshll.u32 %s3021_s11, 7 }
  0xc1   : > { %s3266_s10 = scalar_lea.hbm %s3591_s4, %s3649_s8  ;;  %s365_s17 = scalar_lea.vmem [#allocation10], %s3650_s2 }
  0xc2   : > { %s372_s26 = sshll.u32 %s365_s17, 4  ;;  %s2788_s15 = scalar_lea.hbm %s3266_s10, 2048  ;;  %s3270_s26 = int_to_ptr.vmem [resolvable:$true] %s372_s26 }
  0xc3   : > { %p2789_p6 = scmp.ne.s32.totalorder %s3266_s10, %s2788_s15  ;;  %s2793_s7 = scalar_lea.hbm %s3591_s4, 4096 }
  0xc4   : > { %p2794_p12 = scmp.lt.u32.totalorder %s3266_s10, %s3591_s4  ;;  %p2795_p3 = scmp.lt.u32.totalorder %s2793_s7, %s2788_s15 }
  0xc5   : > { %p2791_p7 = pnand %p2789_p6, %p3045_p9  ;;  %p2797_p5 = scmp.lt.u32.totalorder %s2788_s15, %s3266_s10 }
  0xc6   : > { %p2796_p2 = por %p2795_p3, %p2794_p12 }
  0xc7   : > { %p2792_p11 = pneg %p2791_p7 }
  0xc8   : > { %p2798_p8 = por %p2797_p5, %p2796_p2 }
  0xca   : > { %p2799_p4 = pnand %p2798_p8, %p2792_p11 }
  0xcc   : > { %2802 = shalt.err (!%p2799_p4)
}
  0xcd   : > { %s2803_s11 = scalar_lea.vmem %s3270_s26, 2048  ;;  %s2930_s13 = smov [#allocation10]  }
  0xce   : > { %p2804_p10 = scmp.ne.s32.totalorder %s3270_s26, %s2803_s11  ;;  %s2808_s30 = sshll.u32 %s2930_s13, 4  ;;  %s2809_s30 = int_to_ptr.vmem [resolvable:$false] %s2808_s30 }
  0xcf   : > { %s2810_s12 = scalar_lea.vmem %s2809_s30, 4096  ;;  %p2811_p13 = scmp.lt.s32.totalorder %s3270_s26, %s2809_s30 }
  0xd0   : > { %p2806_p1 = pnand %p2804_p10, %p3045_p9  ;;  %p2812_p6 = scmp.lt.s32.totalorder %s2810_s12, %s2803_s11 }
  0xd2   : > { %p2807_p0 = pneg %p2806_p1  ;;  %p2813_p7 = por %p2812_p6, %p2811_p13 }
  0xd4   : > { %p2814_p12 = pnand %p2813_p7, %p2807_p0 }
  0xd6   : > { %2817 = shalt.err (!%p2814_p12)
}
  0xd7   : > { %p3651_p11 = scmp.ne.s32.totalorder %s3631_s18, 0  ;;  %p3652_p9 = scmp.ne.s32.totalorder %s3640_s14, 0 }
  0xd8   : > { %s386_s23 = sand.u32 (!%p3652_p9), 1, %s3104_s20   ;;  %s3301_s8 = sand.u32 (!%p3652_p9), 1, %s2900_s25  }
  0xd9   : > { %2475 = dma.hbm_to_vmem [thread:$0]  (!%p3651_p11), %s3266_s10, 2048, %s3270_s26, %s3039_s21, %s2926_s24, %s2926_s24, %s2927_s19  }
  0xda   : > { %384 = sbr.rel (%p3652_p9) target bundleno = 834 (0x342), region = 48  ;;  %s387_s3 = scalar_lea.sflag (!%p3652_p9), [#allocation4], %s386_s23 }
  0xdb   : > { %s2430_s1 = smul.u32 (!%p3652_p9), 160, %s3301_s8  ;;  %p3653_p3 = scmp.ne.s32.totalorder (!%p3652_p9), %s3634_s9, 0 }
  0xdd   : > { %s3304_s18 = scalar_lea.vmem (!%p3652_p9), [#allocation3], %s2430_s1 }
  0xe1   : > { %2871 = dma.done.wait (%p3653_p3), %s387_s3, 2560  }
  0xe2   : > { %2873 = vsyncadd (%p3653_p3), %s387_s3, 4294964736  ;;  %p3654_p2 = scmp.eq.s32.totalorder %s3104_s20, 0 }
  0xe4   : > { %2875 = dma.done.wait (%p3654_p2), [#allocation7], 5120   ;;  %p3655_p5 = pmov %p3654_p2 }
  0xe5   : > { %s2044_s21 = sshll.u32 %s3301_s8, 6 }
  0xe6   : > { %2877 = vsyncadd (%p3655_p5), [#allocation7], 4294962176  ;;  %s3315_s14 = scalar_lea.vmem [#allocation8], %s2044_s21 }
  0xe7   : > { %2879 = dma.done.wait (%p3653_p3), %s387_s3, 5120  }
  0xe8   : > { %2881 = vsyncadd (%p3653_p3), %s387_s3, 4294962176  ;;  %s3322_s24 = sshll.u32 %s3301_s8, 7  ;;  %p3656_p8 = pmov %p3654_p2 }
  0xe9   : > { %s3325_s19 = scalar_lea.vmem [#allocation9], %s3322_s24  ;;  %s3328_s10 = scalar_lea.vmem [#allocation10], %s3322_s24 }
  0xea   : > { %2883 = dma.done.wait (%p3656_p8), [#allocation7], 2048   ;;  %p3657_p4 = pmov %p3654_p2 }
  0xeb   : > { %p3658_p10 = pmov %p3654_p2 }
  0xec   : > { %2885 = vsyncadd (%p3657_p4), [#allocation7], 4294965248 }
  0xed   : > { %2887 = dma.done.wait (%p3658_p10), [#allocation13], 16   ;;  %p3659_p1 = pmov %p3654_p2 }
  0xee   : > { %v2931_v0 = vmov 0   ;;  %v2550_v1 = vld [vmem:[#allocation6 + $0x40] sm:$0xff]   ;;  %v2554_v5 = vld [vmem:[#allocation6 + $0x48] sm:$0xff]   ;;  %v2558_v9 = vld [vmem:[#allocation6 + $0x50] sm:$0xff]   ;;  %s3501_s20 = scalar_lea.vmem [#allocation14], %s3322_s24  ;;  %s2123_s9 = sshll.u32 %s2908_s27, 11 }
  0xef   : > { %2889 = vsyncadd (%p3659_p1), [#allocation13], 4294967280  ;;  %2548 = vset.pattern.permute.xlu0 %v2931_v0  ;;  %2549 = vset.pattern.permute.xlu1 %v2931_v0  ;;  %v2551_v2 = vld [vmem:[#allocation6 + $0xc0] sm:$0xff]   ;;  %v2555_v6 = vld [vmem:[#allocation6 + $0xc8] sm:$0xff]   ;;  %s1848_s2 = sshll.u32 %s3501_s20, 4  ;;  %s3660_s17 = sld [smem:[#allocation26_spill]]  ;;  %s3535_s2 = int_to_ptr.vmem [resolvable:$true] %s1848_s2 }
  0xf0   : > { %2124 = vmatprep.subr.bf16.mxu0 %v2550_v1  ;;  %v2552_v3 = vld [vmem:[#allocation6] sm:$0xff]   ;;  %2188 = vmatprep.subr.bf16.mxu1 %v2551_v2  ;;  %v2556_v7 = vld [vmem:[#allocation6 + $0x8] sm:$0xff]   ;;  %v2559_v10 = vld [vmem:[#allocation6 + $0xd0] sm:$0xff]   ;;  %s3661_s16 = sld [smem:[#allocation32_spill]]  ;;  %s1835_s27 = scalar_lea.sflag [#allocation5], %s3301_s8 }
  0xf1   : > { %v2553_v4 = vld [vmem:[#allocation6 + $0x80] sm:$0xff]   ;;  %2125 = vmatpush3.bf16.msra.mxu0 %v2552_v3  ;;  %v2557_v8 = vld [vmem:[#allocation6 + $0x88] sm:$0xff]   ;;  %v2560_v11 = vld [vmem:[#allocation6 + $0x10] sm:$0xff]   ;;  %s2818_s7 = scalar_lea.vmem %s3535_s2, 2048  ;;  %s2932_s0 = smov [#allocation14]  }
  0xf2   : > { %2189 = vmatpush3.bf16.msra.mxu1 %v2553_v4  ;;  %2126 = vmatprep.subr.bf16.mxu0 %v2554_v5  ;;  %v2561_v12 = vld [vmem:[#allocation6 + $0x90] sm:$0xff]   ;;  %v2562_v13 = vld [vmem:[#allocation6 + $0x58] sm:$0xff]   ;;  %v2566_v17 = vld [vmem:[#allocation6 + $0x60] sm:$0xff]   ;;  %p2819_p0 = scmp.ne.s32.totalorder %s3535_s2, %s2818_s7  ;;  %s2822_s29 = sshll.u32 %s2932_s0, 4  ;;  %s2823_s29 = int_to_ptr.vmem [resolvable:$false] %s2822_s29 }
  0xf3   : > { %2190 = vmatprep.subr.bf16.mxu1 %v2555_v6  ;;  %v2563_v14 = vld [vmem:[#allocation6 + $0xd8] sm:$0xff]   ;;  %v2567_v18 = vld [vmem:[#allocation6 + $0xe0] sm:$0xff]   ;;  %v2570_v21 = vld [vmem:[#allocation6 + $0x68] sm:$0xff]   ;;  %s2824_s11 = scalar_lea.vmem %s2823_s29, 4096  ;;  %p2825_p12 = scmp.lt.s32.totalorder %s3535_s2, %s2823_s29 }
  0xf4   : > { %v2564_v15 = vld [vmem:[#allocation6 + $0x18] sm:$0xff]   ;;  %v2568_v19 = vld [vmem:[#allocation6 + $0x20] sm:$0xff]   ;;  %v2571_v22 = vld [vmem:[#allocation6 + $0xe8] sm:$0xff]   ;;  %p2826_p11 = scmp.lt.s32.totalorder %s2824_s11, %s2818_s7 }
  0xf5   : > { %2127 = vmatpush3.bf16.msra.mxu0 %v2556_v7  ;;  %v2565_v16 = vld [vmem:[#allocation6 + $0x98] sm:$0xff]   ;;  %v2569_v20 = vld [vmem:[#allocation6 + $0xa0] sm:$0xff]   ;;  %v2572_v23 = vld [vmem:[#allocation6 + $0x28] sm:$0xff]   ;;  %p3662_p13 = scmp.ne.s32.totalorder %s3660_s17, 0 }
  0xf6   : > { %2191 = vmatpush3.bf16.msra.mxu1 %v2557_v8  ;;  %2128 = vmatprep.subr.bf16.mxu0 %v2558_v9  ;;  %v2573_v24 = vld [vmem:[#allocation6 + $0xa8] sm:$0xff]   ;;  %v2574_v25 = vld [vmem:[#allocation6 + $0x70] sm:$0xff]   ;;  %v2578_v29 = vld [vmem:[#allocation6 + $0x78] sm:$0xff]   ;;  %s3533_s22 = scalar_lea.hbm %s3661_s16, %s2123_s9  ;;  %p2827_p9 = por %p2826_p11, %p2825_p12 }
  0xf7   : > { %2192 = vmatprep.subr.bf16.mxu1 %v2559_v10  ;;  %v2575_v26 = vld [vmem:[#allocation6 + $0xf0] sm:$0xff]   ;;  %v2579_v30 = vld [vmem:[#allocation6 + $0xf8] sm:$0xff]   ;;  %v504_v33 = vld [vmem:[%s3304_s18 + $0x8] sm:$0xff]  ;;  %p2820_p6 = pnand %p2819_p0, %p3662_p13 }
  0xf8   : > { %v2576_v27 = vld [vmem:[#allocation6 + $0x30] sm:$0xff]   ;;  %v2580_v31 = vld [vmem:[#allocation6 + $0x38] sm:$0xff]   ;;  %v503_v35 = vld [vmem:[%s3304_s18] sm:$0xff]  ;;  %v524_v36 = vunpack.c.l.s8.bf16 %v504_v33  ;;  %v529_v37 = vunpack.c.h.s8.bf16 %v504_v33 }
  0xf9   : > { %2129 = vmatpush3.bf16.msra.mxu0 %v2560_v11  ;;  %v2577_v28 = vld [vmem:[#allocation6 + $0xb0] sm:$0xff]   ;;  %v2581_v32 = vld [vmem:[#allocation6 + $0xb8] sm:$0xff]   ;;  %v523_v41 = vunpack.c.l.s8.bf16 %v503_v35  ;;  %v2582_v43 = vld [vmem:[#allocation6 + $0x100] sm:$0xff]   ;;  %v528_v48 = vunpack.c.h.s8.bf16 %v503_v35  ;;  %p2821_p7 = pneg %p2820_p6 }
  0xfa   : > { %2193 = vmatpush3.bf16.msra.mxu1 %v2561_v12  ;;  %2130 = vmatprep.subr.bf16.mxu0 %v2562_v13  ;;  %v506_v34 = vld [vmem:[%s3304_s18 + $0x18] sm:$0xff]  ;;  %v505_v39 = vld [vmem:[%s3304_s18 + $0x10] sm:$0xff]  ;;  %v2583_v44 = vld [vmem:[#allocation6 + $0x108] sm:$0xff]  }
  0xfb   : > { %2194 = vmatprep.subr.bf16.mxu1 %v2563_v14  ;;  %v526_v38 = vunpack.c.l.s8.bf16 %v506_v34  ;;  %v531_v40 = vunpack.c.h.s8.bf16 %v506_v34  ;;  %v525_v42 = vunpack.c.l.s8.bf16 %v505_v39  ;;  %931 = vmatprep.mubr.bf16.mxu0 %v524_v36  ;;  %v509_v45 = vld [vmem:[%s3304_s18 + $0x30] sm:$0xff]  ;;  %v511_v46 = vld [vmem:[%s3304_s18 + $0x40] sm:$0xff]  ;;  %v530_v49 = vunpack.c.h.s8.bf16 %v505_v39  ;;  %v2585_v52 = vld [vmem:[#allocation6 + $0x118] sm:$0xff]   ;;  %p2828_p3 = pnand %p2827_p9, %p2821_p7 }
  0xfc   : > { %v2584_v47 = vld [vmem:[#allocation6 + $0x110] sm:$0xff]   ;;  %v534_v50 = vunpack.c.l.s8.bf16 %v509_v45  ;;  %v536_v51 = vunpack.c.l.s8.bf16 %v511_v46  ;;  %v508_v53 = vld [vmem:[%s3304_s18 + $0x28] sm:$0xff]  ;;  %v510_v54 = vld [vmem:[%s3304_s18 + $0x38] sm:$0xff]  ;;  %v539_v61 = vunpack.c.h.s8.bf16 %v509_v45  ;;  %v541_v62 = vunpack.c.h.s8.bf16 %v511_v46 }
  0xfd   : > { %2131 = vmatpush3.bf16.msra.mxu0 %v2564_v15  ;;  %1028 = vmatprep.mubr.bf16.mxu1 %v526_v38  ;;  %v1257_v55 = vld [vmem:[%s3328_s10] sm:$0xff]  ;;  %v1259_v57 = vld [vmem:[%s3328_s10 + $0x10] sm:$0xff]  ;;  %v533_v58 = vunpack.c.l.s8.bf16 %v508_v53  ;;  %v535_v59 = vunpack.c.l.s8.bf16 %v510_v54  ;;  %v1258_v60 = vld [vmem:[%s3328_s10 + $0x8] sm:$0xff]  ;;  %v538_v7 = vunpack.c.h.s8.bf16 %v508_v53  ;;  %v540_v8 = vunpack.c.h.s8.bf16 %v510_v54 }
  0xfe   : > { %2195 = vmatpush3.bf16.msra.mxu1 %v2565_v16  ;;  %2132 = vmatprep.subr.bf16.mxu0 %v2566_v17  ;;  %v2586_v56 = vld [vmem:[#allocation6 + $0x120] sm:$0xff]   ;;  %v2587_v63 = vld [vmem:[#allocation6 + $0x128] sm:$0xff]   ;;  %v1260_v0 = vld [vmem:[%s3328_s10 + $0x18] sm:$0xff] }
  0xff   : > { %2196 = vmatprep.subr.bf16.mxu1 %v2567_v18  ;;  %1275 = vperm.xlu0 %2548, %v1257_v55   ;;  %v1261_v1 = vld [vmem:[%s3328_s10 + $0x20] sm:$0xff]  ;;  %v514_v2 = vld [vmem:[%s3304_s18 + $0x58] sm:$0xff]  ;;  %v516_v3 = vld [vmem:[%s3304_s18 + $0x68] sm:$0xff] }
 0x100   : > { %1285 = vperm.xlu1 %2549, %v1259_v57   ;;  %v2588_v4 = vld [vmem:[#allocation6 + $0x130] sm:$0xff]   ;;  %v1262_v5 = vld [vmem:[%s3328_s10 + $0x28] sm:$0xff]  ;;  %v544_v9 = vunpack.c.l.s8.bf16 %v514_v2  ;;  %v546_v10 = vunpack.c.l.s8.bf16 %v516_v3  ;;  %v2589_v11 = vld [vmem:[#allocation6 + $0x138] sm:$0xff]  }
 0x101   : > { %2133 = vmatpush3.bf16.msra.mxu0 %v2568_v19  ;;  %v1263_v6 = vld [vmem:[%s3328_s10 + $0x30] sm:$0xff]  ;;  %v1264_v12 = vld [vmem:[%s3328_s10 + $0x38] sm:$0xff]  ;;  %v1265_v13 = vld [vmem:[%s3328_s10 + $0x40] sm:$0xff] }
 0x102   : > { %2197 = vmatpush3.bf16.msra.mxu1 %v2569_v20  ;;  %2134 = vmatprep.subr.bf16.mxu0 %v2570_v21  ;;  %v513_v14 = vld [vmem:[%s3304_s18 + $0x50] sm:$0xff]  ;;  %v515_v15 = vld [vmem:[%s3304_s18 + $0x60] sm:$0xff]  ;;  %v1266_v16 = vld [vmem:[%s3328_s10 + $0x48] sm:$0xff]  ;;  %v549_v20 = vunpack.c.h.s8.bf16 %v514_v2  ;;  %v551_v21 = vunpack.c.h.s8.bf16 %v516_v3 }
 0x103   : > { %2198 = vmatprep.subr.bf16.mxu1 %v2571_v22  ;;  %1280 = vperm.xlu0 %2548, %v1258_v60   ;;  %v1267_v17 = vld [vmem:[%s3328_s10 + $0x50] sm:$0xff]  ;;  %v543_v18 = vunpack.c.l.s8.bf16 %v513_v14  ;;  %v545_v19 = vunpack.c.l.s8.bf16 %v515_v15  ;;  %v1268_v22 = vld [vmem:[%s3328_s10 + $0x58] sm:$0xff]  ;;  %v520_v34 = vld [vmem:[%s3304_s18 + $0x88] sm:$0xff] }
 0x104   : > { %1290 = vperm.xlu1 %2549, %v1260_v0   ;;  %v518_v33 = vld [vmem:[%s3304_s18 + $0x78] sm:$0xff]  ;;  %v555_v36 = vunpack.c.l.s8.bf16 %v520_v34  ;;  %v507_v39 = vld [vmem:[%s3304_s18 + $0x20] sm:$0xff]  ;;  %v517_v46 = vld [vmem:[%s3304_s18 + $0x70] sm:$0xff] }
 0x105   : > { %2135 = vmatpush3.bf16.msra.mxu0 %v2572_v23  ;;  %v1269_v23 = vld [vmem:[%s3328_s10 + $0x60] sm:$0xff]  ;;  %v553_v35 = vunpack.c.l.s8.bf16 %v518_v33  ;;  %v2591_v54 = vld [vmem:[#allocation11 + $0x48] sm:$0xff]   ;;  %v2592_v55 = vld [vmem:[#allocation11 + $0x50] sm:$0xff]  }
 0x106   : > { %2199 = vmatpush3.bf16.msra.mxu1 %v2573_v24  ;;  %2136 = vmatprep.subr.bf16.mxu0 %v2574_v25  ;;  %v519_v24 = vld [vmem:[%s3304_s18 + $0x80] sm:$0xff]  ;;  %v521_v25 = vld [vmem:[%s3304_s18 + $0x90] sm:$0xff]  ;;  %v2603_v3 = vld [vmem:[#allocation11 + $0x78] sm:$0xff]  }
 0x107   : > { %2200 = vmatprep.subr.bf16.mxu1 %v2575_v26  ;;  %1295 = vperm.xlu0 %2548, %v1261_v1   ;;  %v1270_v26 = vld [vmem:[%s3328_s10 + $0x68] sm:$0xff]  ;;  %v561_v38 = vunpack.c.h.s8.bf16 %v521_v25  ;;  %v2590_v53 = vld [vmem:[#allocation11 + $0x40] sm:$0xff]   ;;  %v3382_v60 = vld [vmem:[#allocation11 + $0x10] sm:$0xff]  }
 0x108   : > { %1300 = vperm.xlu1 %2549, %v1262_v5   ;;  %v3374_v57 = vld [vmem:[#allocation11] sm:$0xff]   ;;  %v2600_v0 = vld [vmem:[#allocation11 + $0x70] sm:$0xff]   ;;  %v3394_v1 = vld [vmem:[#allocation11 + $0x28] sm:$0xff]  }
 0x109   : > { %2137 = vmatpush3.bf16.msra.mxu0 %v2576_v27  ;;  %v548_v27 = vunpack.c.h.s8.bf16 %v513_v14  ;;  %v3398_v2 = vld [vmem:[#allocation11 + $0x30] sm:$0xff]   ;;  %v2606_v5 = vld [vmem:[%s3315_s14] sm:$0xff]  }
 0x10a   : > { %2201 = vmatpush3.bf16.msra.mxu1 %v2577_v28  ;;  %2138 = vmatprep.subr.bf16.mxu0 %v2578_v29  ;;  %v550_v28 = vunpack.c.h.s8.bf16 %v515_v15  ;;  %v1271_v29 = vld [vmem:[%s3328_s10 + $0x70] sm:$0xff] }
 0x10b   : > { %2202 = vmatprep.subr.bf16.mxu1 %v2579_v30  ;;  %1305 = vperm.xlu0 %2548, %v1263_v6   ;;  %v554_v30 = vunpack.c.l.s8.bf16 %v519_v24  ;;  %v2607_v6 = vld [vmem:[%s3315_s14 + $0x8] sm:$0xff]  }
 0x10c   : > { %1310 = vperm.xlu1 %2549, %v1264_v12  }
 0x10d   : > { %2139 = vmatpush3.bf16.msra.mxu0 %v2580_v31  ;;  %v556_v31 = vunpack.c.l.s8.bf16 %v521_v25 }
 0x10e   : > { %2203 = vmatpush3.bf16.msra.mxu1 %v2581_v32  ;;  %2300 = vmatprep.subr.bf16.mxu0 %v2582_v43  ;;  %v1272_v32 = vld [vmem:[%s3328_s10 + $0x78] sm:$0xff] }
 0x10f   : > { %1315 = vperm.xlu0 %2548, %v1265_v13   ;;  %2332 = vmatprep.subr.bf16.mxu1 %v2590_v53 }
 0x110   : > { %932 = vmatmul.mubr.bf16.vlgmr.msra.gmra.mrb[0].mxu0 %v523_v41  ;;  %1320 = vperm.xlu1 %2549, %v1266_v16   ;;  %v560_v41 = vunpack.c.h.s8.bf16 %v520_v34 }
 0x111   : > { %1029 = vmatmul.mubr.bf16.vlgmr.msra.gmra.mrb[0].mxu1 %v525_v42  ;;  %939 = vmatprep.mubr.bf16.mxu0 %v529_v37  ;;  %v559_v37 = vunpack.c.h.s8.bf16 %v519_v24  ;;  %v527_v42 = vunpack.c.l.s8.bf16 %v507_v39 }
 0x112   : > { %2301 = vmatpush3.bf16.msra.mxu0 %v2582_v43  ;;  %1036 = vmatprep.mubr.bf16.mxu1 %v531_v40  ;;  %v558_v40 = vunpack.c.h.s8.bf16 %v518_v33  ;;  %v512_v43 = vld [vmem:[%s3304_s18 + $0x48] sm:$0xff] }
 0x113   : > { %2302 = vmatprep.subr.bf16.mxu0 %v2583_v44  ;;  %1325 = vperm.xlu0 %2548, %v1267_v17   ;;  %v537_v45 = vunpack.c.l.s8.bf16 %v512_v43 }
 0x114   : > { %1330 = vperm.xlu1 %2549, %v1268_v22   ;;  %2333 = vmatpush3.bf16.msra.mxu1 %v2590_v53 }
 0x115   : > { %2334 = vmatprep.subr.bf16.mxu1 %v2591_v54 }
 0x116   : > { %2303 = vmatpush3.bf16.msra.mxu0 %v2583_v44  ;;  %v532_v44 = vunpack.c.h.s8.bf16 %v507_v39 }
 0x117   : > { %2304 = vmatprep.subr.bf16.mxu0 %v2584_v47  ;;  %1335 = vperm.xlu0 %2548, %v1269_v23  }
 0x118   : > { %940 = vmatmul.mubr.bf16.gmra.mrb[4].mxu0 %v528_v48  ;;  %1340 = vperm.xlu1 %2549, %v1270_v26   ;;  %v547_v48 = vunpack.c.l.s8.bf16 %v517_v46 }
 0x119   : > { %1037 = vmatmul.mubr.bf16.gmra.mrb[4].mxu1 %v530_v49  ;;  %947 = vmatprep.mubr.bf16.mxu0 %v534_v50  ;;  %v522_v49 = vld [vmem:[%s3304_s18 + $0x98] sm:$0xff]  ;;  %v552_v50 = vunpack.c.h.s8.bf16 %v517_v46 }
 0x11a   : > { %1044 = vmatprep.mubr.bf16.mxu1 %v536_v51  ;;  %2305 = vmatpush3.bf16.msra.mxu0 %v2584_v47  ;;  %v542_v47 = vunpack.c.h.s8.bf16 %v512_v43  ;;  %v557_v51 = vunpack.c.l.s8.bf16 %v522_v49 }
 0x11b   : > { %2306 = vmatprep.subr.bf16.mxu0 %v2585_v52  ;;  %1345 = vperm.xlu0 %2548, %v1271_v29  }
 0x11c   : > { %1350 = vperm.xlu1 %2549, %v1272_v32   ;;  %2335 = vmatpush3.bf16.msra.mxu1 %v2591_v54 }
 0x11d   : > { %2336 = vmatprep.subr.bf16.mxu1 %v2592_v55 }
 0x11e   : > { %2307 = vmatpush3.bf16.msra.mxu0 %v2585_v52  ;;  %v562_v52 = vunpack.c.h.s8.bf16 %v522_v49 }
 0x11f   : > { %2308 = vmatprep.subr.bf16.mxu0 %v2586_v56 }
 0x120   : > { %948 = vmatmul.mubr.bf16.gmra.mrb[8].mxu0 %v533_v58  ;;  %2337 = vmatpush3.bf16.msra.mxu1 %v2592_v55  ;;  %v2594_v58 = vld [vmem:[#allocation11 + $0x60] sm:$0xff]  }
 0x121   : > { %1045 = vmatmul.mubr.bf16.gmra.mrb[8].mxu1 %v535_v59  ;;  %955 = vmatprep.mubr.bf16.mxu0 %v539_v61  ;;  %v3378_v59 = vld [vmem:[#allocation11 + $0x8] sm:$0xff]  }
 0x122   : > { %1052 = vmatprep.mubr.bf16.mxu1 %v541_v62  ;;  %2309 = vmatpush3.bf16.msra.mxu0 %v2586_v56  ;;  %v2593_v56 = vld [vmem:[#allocation11 + $0x58] sm:$0xff]   ;;  %v2597_v61 = vld [vmem:[#allocation11 + $0x68] sm:$0xff]  }
 0x123   : > { %2310 = vmatprep.subr.bf16.mxu0 %v2587_v63  ;;  %2338 = vmatprep.subr.bf16.mxu1 %v2593_v56  ;;  %v3386_v62 = vld [vmem:[#allocation11 + $0x18] sm:$0xff]  }
 0x124   : > { %2339 = vmatpush3.bf16.msra.mxu1 %v2593_v56 }
 0x125   : > { %2340 = vmatprep.subr.bf16.mxu1 %v2594_v58 }
 0x126   : > { %2311 = vmatpush3.bf16.msra.mxu0 %v2587_v63  ;;  %v3390_v63 = vld [vmem:[#allocation11 + $0x20] sm:$0xff]  }
 0x127   : > { %2312 = vmatprep.subr.bf16.mxu0 %v2588_v4 }
 0x128   : > { %956 = vmatmul.mubr.bf16.gmra.mrb[12].mxu0 %v538_v7  ;;  %2341 = vmatpush3.bf16.msra.mxu1 %v2594_v58  ;;  %v2608_v7 = vld [vmem:[%s3315_s14 + $0x10] sm:$0xff]  }
 0x129   : > { %1053 = vmatmul.mubr.bf16.gmra.mrb[12].mxu1 %v540_v8  ;;  %963 = vmatprep.mubr.bf16.mxu0 %v544_v9  ;;  %v2609_v8 = vld [vmem:[%s3315_s14 + $0x18] sm:$0xff]  }
 0x12a   : > { %1060 = vmatprep.mubr.bf16.mxu1 %v546_v10  ;;  %2313 = vmatpush3.bf16.msra.mxu0 %v2588_v4  ;;  %v3402_v4 = vld [vmem:[#allocation11 + $0x38] sm:$0xff]  }
 0x12b   : > { %2314 = vmatprep.subr.bf16.mxu0 %v2589_v11  ;;  %2342 = vmatprep.subr.bf16.mxu1 %v2597_v61 }
 0x12c   : > { %2343 = vmatpush3.bf16.msra.mxu1 %v2597_v61 }
 0x12d   : > { %2344 = vmatprep.subr.bf16.mxu1 %v2600_v0 }
 0x12e   : > { %2315 = vmatpush3.bf16.msra.mxu0 %v2589_v11 }
 0x12f   : > { %2364 = vmatprep.subr.bf16.mxu0 %v3374_v57 }
 0x130   : > { %964 = vmatmul.mubr.bf16.gmra.mrb[16].mxu0 %v543_v18  ;;  %2345 = vmatpush3.bf16.msra.mxu1 %v2600_v0 }
 0x131   : > { %1061 = vmatmul.mubr.bf16.gmra.mrb[16].mxu1 %v545_v19  ;;  %971 = vmatprep.mubr.bf16.mxu0 %v549_v20 }
 0x132   : > { %1068 = vmatprep.mubr.bf16.mxu1 %v551_v21  ;;  %2346 = vmatprep.subr.bf16.mxu1 %v2603_v3 }
 0x134   : > { %2347 = vmatpush3.bf16.msra.mxu1 %v2603_v3 }
 0x135   : > { %2396 = vmatprep.subr.bf16.mxu1 %v3374_v57 }
 0x138   : > { %972 = vmatmul.mubr.bf16.gmra.mrb[20].mxu0 %v548_v27 }
 0x139   : > { %1069 = vmatmul.mubr.bf16.gmra.mrb[20].mxu1 %v550_v28  ;;  %979 = vmatprep.mubr.bf16.mxu0 %v554_v30 }
 0x13a   : > { %1076 = vmatprep.mubr.bf16.mxu1 %v556_v31 }
 0x140   : > { %980 = vmatmul.mubr.bf16.gmra.mrb[24].mxu0 %v553_v35 }
 0x141   : > { %1077 = vmatmul.mubr.bf16.gmra.mrb[24].mxu1 %v555_v36  ;;  %987 = vmatprep.mubr.bf16.mxu0 %v559_v37 }
 0x142   : > { %1084 = vmatprep.mubr.bf16.mxu1 %v561_v38 }
 0x148   : > { %988 = vmatmul.mubr.bf16.gmra.mrb[28].mxu0 %v558_v40 }
 0x149   : > { %1085 = vmatmul.mubr.bf16.gmra.mrb[28].mxu1 %v560_v41  ;;  %2316 = vmatprep.mubr.bf16.mxu0 %v527_v42 }
 0x150   : > { %2317 = vmatmul.mubr.bf16.vlgmr.msra.gmra.mrb[32].mxu0 %v532_v44 }
 0x151   : > { %2320 = vmatprep.mubr.bf16.mxu0 %v537_v45  ;;  %2365 = vmatpush3.bf16.msra.mxu0 %v3374_v57 }
 0x152   : > { %2366 = vmatprep.subr.bf16.mxu0 %v3378_v59 }
 0x155   : > { %2367 = vmatpush3.bf16.msra.mxu0 %v3378_v59 }
 0x156   : > { %2368 = vmatprep.subr.bf16.mxu0 %v3382_v60 }
 0x158   : > { %2321 = vmatmul.mubr.bf16.gmra.mrb[36].mxu0 %v542_v47 }
 0x159   : > { %2324 = vmatprep.mubr.bf16.mxu0 %v547_v48  ;;  %2369 = vmatpush3.bf16.msra.mxu0 %v3382_v60 }
 0x15a   : > { %2370 = vmatprep.subr.bf16.mxu0 %v3386_v62 }
 0x15d   : > { %2371 = vmatpush3.bf16.msra.mxu0 %v3386_v62 }
 0x15e   : > { %2372 = vmatprep.subr.bf16.mxu0 %v3390_v63 }
 0x160   : > { %2325 = vmatmul.mubr.bf16.gmra.mrb[40].mxu0 %v552_v50 }
 0x161   : > { %2328 = vmatprep.mubr.bf16.mxu0 %v557_v51  ;;  %2373 = vmatpush3.bf16.msra.mxu0 %v3390_v63 }
 0x162   : > { %2374 = vmatprep.subr.bf16.mxu0 %v3394_v1 }
 0x165   : > { %2375 = vmatpush3.bf16.msra.mxu0 %v3394_v1 }
 0x166   : > { %2376 = vmatprep.subr.bf16.mxu0 %v3398_v2 }
 0x168   : > { %2329 = vmatmul.mubr.bf16.gmra.mrb[44].mxu0 %v562_v52 }
 0x169   : > { %2377 = vmatpush3.bf16.msra.mxu0 %v3398_v2  ;;  %2380 = vmatprep.mubr.bf16.mxu0 %v2606_v5 }
 0x16a   : > { %2378 = vmatprep.subr.bf16.mxu0 %v3402_v4 }
 0x16d   : > { %2379 = vmatpush3.bf16.msra.mxu0 %v3402_v4 }
 0x170   : > { %2381 = vmatmul.mubr.bf16.vlgmr.msra.gmra.mrb[48].mxu0 %v2607_v6 }
 0x171   : > { %2384 = vmatprep.mubr.bf16.mxu0 %v2608_v7 }
 0x178   : > { %2385 = vmatmul.mubr.bf16.gmra.mrb[52].mxu0 %v2609_v8 }
 0x1e3   : > { %v2140_v9 = vpop.f32.mrb[0].mxu0 }
 0x1e4   : > { %v2204_v10 = vpop.f32.mrb[0].mxu1  ;;  %v2141_v11 = vpop.f32.mrb[1].mxu0 }
 0x1e5   : > { %v2205_v12 = vpop.f32.mrb[1].mxu1  ;;  %v2142_v13 = vadd.f32 %v2141_v11, %v2140_v9  ;;  %v2143_v15 = vpop.f32.mrb[2].mxu0 }
 0x1e6   : > { %v2206_v14 = vadd.f32 %v2205_v12, %v2204_v10  ;;  %v2207_v16 = vpop.f32.mrb[2].mxu1  ;;  %v2144_v17 = vpop.f32.mrb[3].mxu0 }
 0x1e7   : > { %v2208_v18 = vpop.f32.mrb[3].mxu1  ;;  %v2145_v19 = vadd.f32 %v2144_v17, %v2143_v15 }
 0x1e8   : > { %v2209_v20 = vadd.f32 %v2208_v18, %v2207_v16  ;;  %v3411_v21 = vadd.f32 %v2206_v14, %v2142_v13 }
 0x1ea   : > { %v3413_v22 = vadd.f32 %v2209_v20, %v2145_v19 }
 0x1eb   : > { %v2146_v23 = vpop.f32.mrb[4].mxu0 }
 0x1ec   : > { %v2210_v24 = vpop.f32.mrb[4].mxu1  ;;  %v2147_v25 = vpop.f32.mrb[5].mxu0 }
 0x1ed   : > { %v2211_v26 = vpop.f32.mrb[5].mxu1  ;;  %v2148_v27 = vadd.f32 %v2147_v25, %v2146_v23  ;;  %v2149_v29 = vpop.f32.mrb[6].mxu0 }
 0x1ee   : > { %v2212_v28 = vadd.f32 %v2211_v26, %v2210_v24  ;;  %v2213_v30 = vpop.f32.mrb[6].mxu1  ;;  %v2150_v31 = vpop.f32.mrb[7].mxu0 }
 0x1ef   : > { %v2214_v32 = vpop.f32.mrb[7].mxu1  ;;  %v2151_v33 = vadd.f32 %v2150_v31, %v2149_v29 }
 0x1f0   : > { %v2215_v34 = vadd.f32 %v2214_v32, %v2213_v30  ;;  %v3415_v35 = vadd.f32 %v2212_v28, %v2148_v27 }
 0x1f2   : > { %v3417_v36 = vadd.f32 %v2215_v34, %v2151_v33 }
 0x1f3   : > { %v2152_v37 = vpop.f32.mrb[8].mxu0 }
 0x1f4   : > { %v2216_v38 = vpop.f32.mrb[8].mxu1  ;;  %v2153_v39 = vpop.f32.mrb[9].mxu0 }
 0x1f5   : > { %v2217_v40 = vpop.f32.mrb[9].mxu1  ;;  %v2154_v41 = vadd.f32 %v2153_v39, %v2152_v37  ;;  %v2155_v43 = vpop.f32.mrb[10].mxu0 }
 0x1f6   : > { %v2218_v42 = vadd.f32 %v2217_v40, %v2216_v38  ;;  %v2219_v44 = vpop.f32.mrb[10].mxu1  ;;  %v2156_v45 = vpop.f32.mrb[11].mxu0 }
 0x1f7   : > { %v2220_v46 = vpop.f32.mrb[11].mxu1  ;;  %v2157_v47 = vadd.f32 %v2156_v45, %v2155_v43 }
 0x1f8   : > { %v2221_v48 = vadd.f32 %v2220_v46, %v2219_v44  ;;  %v3419_v49 = vadd.f32 %v2218_v42, %v2154_v41  ;;  %v1276_v41 = vpop.permute.xlu0 %1275  ;;  %v1286_v42 = vpop.permute.xlu1 %1285 }
 0x1fa   : > { %v3421_v50 = vadd.f32 %v2221_v48, %v2157_v47 }
 0x1fb   : > { %v2158_v51 = vpop.f32.mrb[12].mxu0 }
 0x1fc   : > { %v2222_v52 = vpop.f32.mrb[12].mxu1  ;;  %v2159_v53 = vpop.f32.mrb[13].mxu0 }
 0x1fd   : > { %v2223_v54 = vpop.f32.mrb[13].mxu1  ;;  %v2160_v55 = vadd.f32 %v2159_v53, %v2158_v51  ;;  %v2161_v58 = vpop.f32.mrb[14].mxu0 }
 0x1fe   : > { %v2224_v56 = vadd.f32 %v2223_v54, %v2222_v52  ;;  %v2225_v61 = vpop.f32.mrb[14].mxu1  ;;  %v2162_v0 = vpop.f32.mrb[15].mxu0 }
 0x1ff   : > { %v2226_v3 = vpop.f32.mrb[15].mxu1  ;;  %v2163_v5 = vadd.f32 %v2162_v0, %v2161_v58 }
 0x200   : > { %v2227_v6 = vadd.f32 %v2226_v3, %v2225_v61  ;;  %v3423_v7 = vadd.f32 %v2224_v56, %v2160_v55  ;;  %v1281_v61 = vpop.permute.xlu0 %1280  ;;  %v1291_v3 = vpop.permute.xlu1 %1290 }
 0x202   : > { %v3425_v8 = vadd.f32 %v2227_v6, %v2163_v5 }
 0x203   : > { %v2164_v9 = vpop.f32.mrb[16].mxu0 }
 0x204   : > { %v2228_v10 = vpop.f32.mrb[16].mxu1  ;;  %v2165_v11 = vpop.f32.mrb[17].mxu0 }
 0x205   : > { %v2229_v12 = vpop.f32.mrb[17].mxu1  ;;  %v2166_v13 = vadd.f32 %v2165_v11, %v2164_v9  ;;  %v2167_v15 = vpop.f32.mrb[18].mxu0 }
 0x206   : > { %v2230_v14 = vadd.f32 %v2229_v12, %v2228_v10  ;;  %v2231_v16 = vpop.f32.mrb[18].mxu1  ;;  %v2168_v17 = vpop.f32.mrb[19].mxu0 }
 0x207   : > { %v2232_v18 = vpop.f32.mrb[19].mxu1  ;;  %v2169_v19 = vadd.f32 %v2168_v17, %v2167_v15  ;;  %v1296_v17 = vpop.permute.xlu0 %1295 }
 0x208   : > { %v2233_v20 = vadd.f32 %v2232_v18, %v2231_v16  ;;  %v3427_v23 = vadd.f32 %v2230_v14, %v2166_v13 }
 0x20a   : > { %v3429_v24 = vadd.f32 %v2233_v20, %v2169_v19 }
 0x20b   : > { %v2170_v25 = vpop.f32.mrb[20].mxu0 }
 0x20c   : > { %v2234_v26 = vpop.f32.mrb[20].mxu1  ;;  %v2171_v27 = vpop.f32.mrb[21].mxu0 }
 0x20d   : > { %v2235_v28 = vpop.f32.mrb[21].mxu1  ;;  %v2172_v29 = vadd.f32 %v2171_v27, %v2170_v25  ;;  %v2173_v31 = vpop.f32.mrb[22].mxu0 }
 0x20e   : > { %v2236_v30 = vadd.f32 %v2235_v28, %v2234_v26  ;;  %v2237_v32 = vpop.f32.mrb[22].mxu1  ;;  %v2174_v33 = vpop.f32.mrb[23].mxu0 }
 0x20f   : > { %v2238_v34 = vpop.f32.mrb[23].mxu1  ;;  %v2175_v37 = vadd.f32 %v2174_v33, %v2173_v31  ;;  %v1301_v25 = vpop.permute.xlu1 %1300 }
 0x210   : > { %v2239_v38 = vadd.f32 %v2238_v34, %v2237_v32  ;;  %v3431_v39 = vadd.f32 %v2236_v30, %v2172_v29  ;;  %v1306_v30 = vpop.permute.xlu0 %1305 }
 0x212   : > { %v3433_v40 = vadd.f32 %v2239_v38, %v2175_v37 }
 0x213   : > { %v2176_v43 = vpop.f32.mrb[24].mxu0  ;;  %v1311_v38 = vpop.permute.xlu1 %1310 }
 0x214   : > { %v2240_v44 = vpop.f32.mrb[24].mxu1  ;;  %v2177_v45 = vpop.f32.mrb[25].mxu0 }
 0x215   : > { %v2241_v46 = vpop.f32.mrb[25].mxu1  ;;  %v2178_v47 = vadd.f32 %v2177_v45, %v2176_v43  ;;  %v2179_v51 = vpop.f32.mrb[26].mxu0  ;;  %v1227_v43 = vld [vmem:[%s3325_s19 + $0x10] sm:$0xff]  ;;  %v1228_v45 = vld [vmem:[%s3325_s19 + $0x18] sm:$0xff] }
 0x216   : > { %v2242_v48 = vadd.f32 %v2241_v46, %v2240_v44  ;;  %v2243_v52 = vpop.f32.mrb[26].mxu1  ;;  %v2180_v53 = vpop.f32.mrb[27].mxu0 }
 0x217   : > { %v2244_v54 = vpop.f32.mrb[27].mxu1  ;;  %v2181_v55 = vadd.f32 %v2180_v53, %v2179_v51  ;;  %v1226_v51 = vld [vmem:[%s3325_s19 + $0x8] sm:$0xff] }
 0x218   : > { %v2245_v56 = vadd.f32 %v2244_v54, %v2243_v52  ;;  %v3435_v58 = vadd.f32 %v2242_v48, %v2178_v47  ;;  %v1225_v47 = vld [vmem:[%s3325_s19] sm:$0xff]  ;;  %v1316_v54 = vpop.permute.xlu0 %1315 }
 0x21a   : > { %v3437_v0 = vadd.f32 %v2245_v56, %v2181_v55 }
 0x21b   : > { %v2182_v5 = vpop.f32.mrb[28].mxu0 }
 0x21c   : > { %v2246_v6 = vpop.f32.mrb[28].mxu1  ;;  %v2183_v9 = vpop.f32.mrb[29].mxu0 }
 0x21d   : > { %v2247_v10 = vpop.f32.mrb[29].mxu1  ;;  %v2184_v11 = vadd.f32 %v2183_v9, %v2182_v5  ;;  %v2185_v13 = vpop.f32.mrb[30].mxu0 }
 0x21e   : > { %v2248_v12 = vadd.f32 %v2247_v10, %v2246_v6  ;;  %v2249_v14 = vpop.f32.mrb[30].mxu1  ;;  %v2186_v15 = vpop.f32.mrb[31].mxu0 }
 0x21f   : > { %v2250_v16 = vpop.f32.mrb[31].mxu1  ;;  %v2187_v18 = vadd.f32 %v2186_v15, %v2185_v13  ;;  %v1321_v5 = vpop.permute.xlu1 %1320  ;;  %v1232_v13 = vld [vmem:[%s3325_s19 + $0x38] sm:$0xff]  ;;  %v1229_v15 = vld [vmem:[%s3325_s19 + $0x20] sm:$0xff] }
 0x220   : > { %v2251_v19 = vadd.f32 %v2250_v16, %v2249_v14  ;;  %v3439_v20 = vadd.f32 %v2248_v12, %v2184_v11  ;;  %v1231_v11 = vld [vmem:[%s3325_s19 + $0x30] sm:$0xff] }
 0x222   : > { %v3441_v26 = vadd.f32 %v2251_v19, %v2187_v18  ;;  %v1326_v18 = vpop.permute.xlu0 %1325 }
 0x223   : > { %v2318_v27 = vpop.f32.mrb[32].mxu0 }
 0x224   : > { %v1136_v28 = vadd.f32 %v2318_v27, %v3415_v35  ;;  %v1127_v29 = vpop.f32.mrb[33].mxu0 }
 0x225   : > { %v1128_v31 = vadd.f32 %v1127_v29, %v3411_v21  ;;  %v2319_v32 = vpop.f32.mrb[34].mxu0 }
 0x226   : > { %v1355_v33 = vmul.f32 %v1286_v42, %v1136_v28  ;;  %v1139_v34 = vadd.f32 %v2319_v32, %v3417_v36  ;;  %v1130_v37 = vpop.f32.mrb[35].mxu0 }
 0x227   : > { %v1353_v44 = vmul.f32 %v1276_v41, %v1128_v31  ;;  %v1131_v46 = vadd.f32 %v1130_v37, %v3413_v22 }
 0x228   : > { %v1356_v48 = vmul.f32 %v1291_v3, %v1139_v34  ;;  %v1371_v35 = vadd.f32 %v1355_v33, %v1227_v43  ;;  %v1235_v43 = vld [vmem:[%s3325_s19 + $0x50] sm:$0xff] }
 0x229   : > { %v1354_v52 = vmul.f32 %v1281_v61, %v1131_v46  ;;  %v1369_v21 = vadd.f32 %v1353_v44, %v1225_v47  ;;  %v1233_v46 = vld [vmem:[%s3325_s19 + $0x40] sm:$0xff]  ;;  %v1234_v47 = vld [vmem:[%s3325_s19 + $0x48] sm:$0xff] }
 0x22a   : > { %v1372_v53 = vadd.f32 %v1356_v48, %v1228_v45 }
 0x22b   : > { %v1370_v42 = vadd.f32 %v1354_v52, %v1226_v51  ;;  %v2322_v55 = vpop.f32.mrb[36].mxu0 }
 0x22c   : > { %v1418_v36 = vpack.c.bf16 %v1372_v53, %v1371_v35  ;;  %v1152_v56 = vadd.f32 %v2322_v55, %v3423_v7  ;;  %v1143_v41 = vpop.f32.mrb[37].mxu0  ;;  %v1230_v7 = vld [vmem:[%s3325_s19 + $0x28] sm:$0xff] }
 0x22d   : > { %v1144_v22 = vadd.f32 %v1143_v41, %v3419_v49  ;;  %v2323_v3 = vpop.f32.mrb[38].mxu0  ;;  %v1417_v6 = vpack.c.bf16 %v1370_v42, %v1369_v21 }
 0x22e   : > { %v1359_v61 = vmul.f32 %v1306_v30, %v1152_v56  ;;  %v1155_v9 = vadd.f32 %v2323_v3, %v3425_v8  ;;  %v1146_v10 = vpop.f32.mrb[39].mxu0  ;;  %v1331_v8 = vpop.permute.xlu1 %1330  ;;  %v1239_v3 = vld [vmem:[%s3325_s19 + $0x70] sm:$0xff] }
 0x22f   : > { %v1357_v12 = vmul.f32 %v1296_v17, %v1144_v22  ;;  %v1147_v14 = vadd.f32 %v1146_v10, %v3421_v50  ;;  %2348 = vmatprep.mubr.bf16.mxu1 %v1417_v6  ;;  %v1240_v6 = vld [vmem:[%s3325_s19 + $0x78] sm:$0xff]  ;;  %v1238_v10 = vld [vmem:[%s3325_s19 + $0x68] sm:$0xff] }
 0x230   : > { %v1360_v16 = vmul.f32 %v1311_v38, %v1155_v9  ;;  %2349 = vmatmul.mubr.bf16.vlgmr.msra.gmra.mrb[32].mxu1 %v1418_v36  ;;  %v1375_v49 = vadd.f32 %v1359_v61, %v1231_v11  ;;  %v1336_v38 = vpop.permute.xlu0 %1335 }
 0x231   : > { %v1358_v19 = vmul.f32 %v1301_v25, %v1147_v14  ;;  %2404 = vmatpush3.bf16.msra.mxu1 %v3374_v57  ;;  %v1373_v28 = vadd.f32 %v1357_v12, %v1229_v15  ;;  %v2610_v15 = vld [vmem:[%s3315_s14 + $0x20] sm:$0xff]  }
 0x232   : > { %v1376_v27 = vadd.f32 %v1360_v16, %v1232_v13  ;;  %2397 = vmatprep.subr.bf16.mxu1 %v3378_v59  ;;  %v1341_v48 = vpop.permute.xlu1 %1340  ;;  %v2612_v16 = vld [vmem:[%s3315_s14 + $0x30] sm:$0xff]  }
 0x233   : > { %v1374_v17 = vadd.f32 %v1358_v19, %v1230_v7  ;;  %v2326_v29 = vpop.f32.mrb[40].mxu0  ;;  %v2613_v7 = vld [vmem:[%s3315_s14 + $0x38] sm:$0xff]  }
 0x234   : > { %v1168_v50 = vadd.f32 %v2326_v29, %v3431_v39  ;;  %v1159_v30 = vpop.f32.mrb[41].mxu0  ;;  %v1420_v31 = vpack.c.bf16 %v1376_v27, %v1375_v49  ;;  %v1236_v39 = vld [vmem:[%s3325_s19 + $0x58] sm:$0xff]  ;;  %v1346_v42 = vpop.permute.xlu0 %1345  ;;  %v3494_v29 = vld [vmem:[#allocation12] ss:$0 sm:$0xff] }
 0x235   : > { %v1160_v32 = vadd.f32 %v1159_v30, %v3427_v23  ;;  %v2327_v25 = vpop.f32.mrb[42].mxu0  ;;  %2405 = vmatpush3.bf16.msra.mxu1 %v3378_v59  ;;  %v1419_v57 = vpack.c.bf16 %v1374_v17, %v1373_v28 }
 0x236   : > { %v1363_v33 = vmul.f32 %v1326_v18, %v1168_v50  ;;  %v1171_v34 = vadd.f32 %v2327_v25, %v3433_v40  ;;  %v1162_v37 = vpop.f32.mrb[43].mxu0  ;;  %2398 = vmatprep.subr.bf16.mxu1 %v3382_v60  ;;  %v1351_v22 = vpop.permute.xlu1 %1350 }
 0x237   : > { %v1361_v44 = vmul.f32 %v1316_v54, %v1160_v32  ;;  %v1163_v45 = vadd.f32 %v1162_v37, %v3429_v24  ;;  %2352 = vmatprep.mubr.bf16.mxu1 %v1419_v57 }
 0x238   : > { %v1364_v23 = vmul.f32 %v1331_v8, %v1171_v34  ;;  %2353 = vmatmul.mubr.bf16.gmra.mrb[36].mxu1 %v1420_v31  ;;  %v1379_v51 = vadd.f32 %v1363_v33, %v1235_v43 }
 0x239   : > { %v1362_v59 = vmul.f32 %v1321_v5, %v1163_v45  ;;  %2406 = vmatpush3.bf16.msra.mxu1 %v3382_v60  ;;  %v1377_v52 = vadd.f32 %v1361_v44, %v1233_v46 }
 0x23a   : > { %v1380_v40 = vadd.f32 %v1364_v23, %v1236_v39  ;;  %2399 = vmatprep.subr.bf16.mxu1 %v3386_v62 }
 0x23b   : > { %v1378_v35 = vadd.f32 %v1362_v59, %v1234_v47  ;;  %v2330_v53 = vpop.f32.mrb[44].mxu0 }
 0x23c   : > { %v1184_v24 = vadd.f32 %v2330_v53, %v3439_v20  ;;  %v1175_v54 = vpop.f32.mrb[45].mxu0  ;;  %v1422_v21 = vpack.c.bf16 %v1380_v40, %v1379_v51 }
 0x23d   : > { %v1176_v55 = vadd.f32 %v1175_v54, %v3435_v58  ;;  %v2331_v36 = vpop.f32.mrb[46].mxu0  ;;  %2407 = vmatpush3.bf16.msra.mxu1 %v3386_v62  ;;  %v1421_v60 = vpack.c.bf16 %v1378_v35, %v1377_v52  ;;  %v1237_v58 = vld [vmem:[%s3325_s19 + $0x60] sm:$0xff] }
 0x23e   : > { %v1367_v56 = vmul.f32 %v1346_v42, %v1184_v24  ;;  %v1187_v41 = vadd.f32 %v2331_v36, %v3441_v26  ;;  %v1178_v5 = vpop.f32.mrb[47].mxu0  ;;  %2400 = vmatprep.subr.bf16.mxu1 %v3390_v63 }
 0x23f   : > { %v1365_v20 = vmul.f32 %v1336_v38, %v1176_v55  ;;  %v1179_v61 = vadd.f32 %v1178_v5, %v3437_v0  ;;  %2356 = vmatprep.mubr.bf16.mxu1 %v1421_v60 }
 0x240   : > { %v1368_v9 = vmul.f32 %v1351_v22, %v1187_v41  ;;  %2357 = vmatmul.mubr.bf16.gmra.mrb[40].mxu1 %v1422_v21  ;;  %v1383_v26 = vadd.f32 %v1367_v56, %v1239_v3 }
 0x241   : > { %v1366_v62 = vmul.f32 %v1341_v48, %v1179_v61  ;;  %2408 = vmatpush3.bf16.msra.mxu1 %v3390_v63  ;;  %v1381_v12 = vadd.f32 %v1365_v20, %v1237_v58  ;;  %v2611_v63 = vld [vmem:[%s3315_s14 + $0x28] sm:$0xff]  }
 0x242   : > { %v1384_v11 = vadd.f32 %v1368_v9, %v1240_v6  ;;  %2401 = vmatprep.subr.bf16.mxu1 %v3394_v1 }
 0x243   : > { %v1382_v13 = vadd.f32 %v1366_v62, %v1238_v10 }
 0x244   : > { %v1424_v14 = vpack.c.bf16 %v1384_v11, %v1383_v26 }
 0x245   : > { %2409 = vmatpush3.bf16.msra.mxu1 %v3394_v1  ;;  %v1423_v0 = vpack.c.bf16 %v1382_v13, %v1381_v12  ;;  %v2382_v1 = vpop.f32.mrb[48].mxu0 }
 0x246   : > { %2402 = vmatprep.subr.bf16.mxu1 %v3398_v2  ;;  %v1716_v18 = vpop.f32.mrb[49].mxu0 }
 0x247   : > { %2360 = vmatprep.mubr.bf16.mxu1 %v1423_v0  ;;  %v2383_v19 = vpop.f32.mrb[50].mxu0 }
 0x248   : > { %2361 = vmatmul.mubr.bf16.gmra.mrb[44].mxu1 %v1424_v14  ;;  %v1719_v49 = vpop.f32.mrb[51].mxu0 }
 0x249   : > { %2410 = vmatpush3.bf16.msra.mxu1 %v3398_v2  ;;  %2388 = vmatprep.mubr.bf16.mxu1 %v2610_v15 }
 0x24a   : > { %2403 = vmatprep.subr.bf16.mxu1 %v3402_v4 }
 0x24b   : > { %v2386_v27 = vpop.f32.mrb[52].mxu0 }
 0x24c   : > { %v1732_v8 = vpop.f32.mrb[53].mxu0 }
 0x24d   : > { %2411 = vmatpush3.bf16.msra.mxu1 %v3402_v4  ;;  %v2387_v28 = vpop.f32.mrb[54].mxu0 }
 0x24e   : > { %v1735_v17 = vpop.f32.mrb[55].mxu0 }
 0x250   : > { %2389 = vmatmul.mubr.bf16.vlgmr.msra.gmra.mrb[40].mxu1 %v2611_v63 }
 0x251   : > { %2392 = vmatprep.mubr.bf16.mxu1 %v2612_v16 }
 0x258   : > { %2393 = vmatmul.mubr.bf16.gmra.mrb[44].mxu1 %v2613_v7 }
 0x303   : > { %v2350_v2 = vpop.f32.mrb[32].mxu1 }
 0x304   : > { %v1725_v50 = vadd.f32 %v2382_v1, %v2350_v2  ;;  %v1523_v30 = vpop.f32.mrb[33].mxu1 }
 0x305   : > { %v1717_v4 = vadd.f32 %v1716_v18, %v1523_v30  ;;  %v2351_v31 = vpop.f32.mrb[34].mxu1 }
 0x306   : > { %v1788_v32 = vadd.f32 %v3494_v29, %v1725_v50  ;;  %v1728_v25 = vadd.f32 %v2383_v19, %v2351_v31  ;;  %v1526_v57 = vpop.f32.mrb[35].mxu1 }
 0x307   : > { %v1786_v33 = vadd.f32 %v3494_v29, %v1717_v4  ;;  %v1720_v34 = vadd.f32 %v1719_v49, %v1526_v57 }
 0x308   : > { %v1804_v37 = vmax.f32 %v1788_v32, 0.0  ;;  %v1789_v38 = vadd.f32 %v3494_v29, %v1728_v25 }
 0x309   : > { %v1802_v43 = vmax.f32 %v1786_v33, 0.0  ;;  %v1787_v44 = vadd.f32 %v3494_v29, %v1720_v34 }
 0x30a   : > { %1820 = vst [vmem:[%s3501_s20 + $0x10] sm:$0xff] %v1804_v37  ;;  %v1805_v39 = vmax.f32 %v1789_v38, 0.0 }
 0x30b   : > { %1818 = vst [vmem:[%s3501_s20] sm:$0xff] %v1802_v43  ;;  %v1803_v45 = vmax.f32 %v1787_v44, 0.0  ;;  %v2354_v46 = vpop.f32.mrb[36].mxu1 }
 0x30c   : > { %1821 = vst [vmem:[%s3501_s20 + $0x18] sm:$0xff] %v1805_v39  ;;  %v1741_v23 = vadd.f32 %v2386_v27, %v2354_v46  ;;  %v1539_v47 = vpop.f32.mrb[37].mxu1 }
 0x30d   : > { %1819 = vst [vmem:[%s3501_s20 + $0x8] sm:$0xff] %v1803_v45  ;;  %v1733_v48 = vadd.f32 %v1732_v8, %v1539_v47  ;;  %v2355_v59 = vpop.f32.mrb[38].mxu1 }
 0x30e   : > { %v1792_v51 = vadd.f32 %v3494_v29, %v1741_v23  ;;  %v1744_v40 = vadd.f32 %v2387_v28, %v2355_v59  ;;  %v1542_v52 = vpop.f32.mrb[39].mxu1 }
 0x30f   : > { %v1790_v35 = vadd.f32 %v3494_v29, %v1733_v48  ;;  %v1736_v53 = vadd.f32 %v1735_v17, %v1542_v52 }
 0x310   : > { %v1808_v24 = vmax.f32 %v1792_v51, 0.0  ;;  %v1793_v54 = vadd.f32 %v3494_v29, %v1744_v40 }
 0x311   : > { %v1806_v21 = vmax.f32 %v1790_v35, 0.0  ;;  %v1791_v42 = vadd.f32 %v3494_v29, %v1736_v53 }
 0x312   : > { %1824 = vst [vmem:[%s3501_s20 + $0x30] sm:$0xff] %v1808_v24  ;;  %v1809_v55 = vmax.f32 %v1793_v54, 0.0 }
 0x313   : > { %1822 = vst [vmem:[%s3501_s20 + $0x20] sm:$0xff] %v1806_v21  ;;  %v1807_v36 = vmax.f32 %v1791_v42, 0.0 }
 0x314   : > { %1825 = vst [vmem:[%s3501_s20 + $0x38] sm:$0xff] %v1809_v55 }
 0x315   : > { %1823 = vst [vmem:[%s3501_s20 + $0x28] sm:$0xff] %v1807_v36 }
 0x323   : > { %v2390_v60 = vpop.f32.mrb[40].mxu1 }
 0x324   : > { %v1796_v56 = vadd.f32 %v2390_v60, %v3494_v29  ;;  %v1748_v41 = vpop.f32.mrb[41].mxu1 }
 0x325   : > { %v1794_v5 = vadd.f32 %v3494_v29, %v1748_v41  ;;  %v2391_v22 = vpop.f32.mrb[42].mxu1 }
 0x326   : > { %v1812_v3 = vmax.f32 %v1796_v56, 0.0  ;;  %v1797_v20 = vadd.f32 %v2391_v22, %v3494_v29  ;;  %v1751_v6 = vpop.f32.mrb[43].mxu1 }
 0x327   : > { %v1810_v61 = vmax.f32 %v1794_v5, 0.0  ;;  %v1795_v58 = vadd.f32 %v3494_v29, %v1751_v6 }
 0x328   : > { %1828 = vst [vmem:[%s3501_s20 + $0x50] sm:$0xff] %v1812_v3  ;;  %v1813_v9 = vmax.f32 %v1797_v20, 0.0 }
 0x329   : > { %1826 = vst [vmem:[%s3501_s20 + $0x40] sm:$0xff] %v1810_v61  ;;  %v1811_v10 = vmax.f32 %v1795_v58, 0.0 }
 0x32a   : > { %1829 = vst [vmem:[%s3501_s20 + $0x58] sm:$0xff] %v1813_v9 }
 0x32b   : > { %1827 = vst [vmem:[%s3501_s20 + $0x48] sm:$0xff] %v1811_v10  ;;  %v2394_v62 = vpop.f32.mrb[44].mxu1 }
 0x32c   : > { %v1800_v26 = vadd.f32 %v2394_v62, %v3494_v29  ;;  %v1764_v11 = vpop.f32.mrb[45].mxu1 }
 0x32d   : > { %v1798_v12 = vadd.f32 %v3494_v29, %v1764_v11  ;;  %v2395_v13 = vpop.f32.mrb[46].mxu1 }
 0x32e   : > { %v1816_v14 = vmax.f32 %v1800_v26, 0.0  ;;  %v1801_v0 = vadd.f32 %v2395_v13, %v3494_v29  ;;  %v1767_v15 = vpop.f32.mrb[47].mxu1 }
 0x32f   : > { %v1814_v63 = vmax.f32 %v1798_v12, 0.0  ;;  %v1799_v16 = vadd.f32 %v3494_v29, %v1767_v15 }
 0x330   : > { %1832 = vst [vmem:[%s3501_s20 + $0x70] sm:$0xff] %v1816_v14  ;;  %v1817_v7 = vmax.f32 %v1801_v0, 0.0 }
 0x331   : > { %1830 = vst [vmem:[%s3501_s20 + $0x60] sm:$0xff] %v1814_v63  ;;  %v1815_v1 = vmax.f32 %v1799_v16, 0.0 }
 0x332   : > { %1833 = vst [vmem:[%s3501_s20 + $0x78] sm:$0xff] %v1817_v7 }
 0x333   : > { %1831 = vst [vmem:[%s3501_s20 + $0x68] sm:$0xff] %v1815_v1 }
 0x334   : > { %2831 = shalt.err (!%p2828_p3)
}
 0x335   : > { %s2832_s13 = scalar_lea.hbm %s3533_s22, 2048  ;;  %s2836_s23 = scalar_lea.hbm %s3661_s16, 4096 }
 0x336   : > { %p2833_p2 = scmp.ne.s32.totalorder %s3533_s22, %s2832_s13  ;;  %p2837_p4 = scmp.lt.u32.totalorder %s3533_s22, %s3661_s16 }
 0x337   : > { %p2838_p10 = scmp.lt.u32.totalorder %s2836_s23, %s2832_s13  ;;  %p2840_p0 = scmp.lt.u32.totalorder %s2832_s13, %s3533_s22 }
 0x338   : > { %p2834_p5 = pnand %p2833_p2, %p3662_p13 }
 0x339   : > { %p2839_p1 = por %p2838_p10, %p2837_p4 }
 0x33a   : > { %p2835_p8 = pneg %p2834_p5 }
 0x33b   : > { %p2841_p6 = por %p2840_p0, %p2839_p1 }
 0x33d   : > { %p2842_p7 = pnand %p2841_p6, %p2835_p8 }
 0x33f   : > { %2845 = shalt.err (!%p2842_p7)
}
 0x340   : > { %s2933_s18 = smov 128   ;;  %s2934_s21 = smov 8  }
 0x341   : > { %2451 = dma.vmem_to_hbm [thread:$0]  (%p3662_p13), %s3535_s2, 2048, %s3533_s22, %s1835_s27, %s2933_s18, %s2933_s18, %s2934_s21  }
 0x342 PF: > { %s3663_s14 = sld [smem:[#allocation21_spill]]  ;;  %s3664_s24 = sld [smem:[#allocation27_spill]] }
 0x343   : > { %s3665_s19 = sld [smem:[#allocation23_spill]] }
 0x348   : > { %s1863_s10 = sand.u32 1, %s3663_s14   ;;  %p3666_p12 = scmp.ne.s32.totalorder %s3664_s24, 0 }
 0x349   : > { %p3667_p11 = scmp.ge.s32.totalorder %s3665_s19, 2  ;;  %s1864_s20 = scalar_lea.sflag [#allocation5], %s1863_s10 }
 0x34b   : > { %p2477_p9 = pnand %p3667_p11, %p3666_p12 }
 0x34d   : > { %2891 = dma.done.wait (!%p2477_p9), %s1864_s20, 2048  }
 0x34e   : > { %2893 = vsyncadd (!%p2477_p9), %s1864_s20, 4294965248  ;;  %s25_s29 = sadd.s32 1, %s3665_s19   ;;  %s3668_s9 = sld [smem:[#allocation22_spill]] }
 0x34f   : > { %p22_p3 = scmp.ge.s32.totalorder %s25_s29, 4   ;;  %s3669_s26 = sld [smem:[#allocation25_spill]] }
 0x350   : > { %s3670_s8 = sld [smem:[#allocation24_spill]]  ;;  %s3671_s24 = smov %s2900_s25 }
 0x351   : > { %s3673_s27 = smov %s2912_s28  ;;  %24 = sbr.rel (!%p22_p3) target bundleno = 14 (0xe), region = 147 }
 0x354   : > { %s3672_s25 = smov %s3668_s9 }
 0x356   : > { %s3674_s28 = smov %s3670_s8 }
 0x358   :  { %1869 = vsyncpa [#allocation4], 1 }
 0x359   :  { %1871 = vsyncpa [#allocation4 + $0x1], 1 }
 0x35a   :  { %1872 = vsyncpa [#allocation7], 1 }
 0x35b   :  { %1873 = vsyncpa [#allocation13], 1 }
 0x35c   :  { %1874 = vsyncpa [#allocation5], 1 }
 0x35d   :  { %1876 = vsyncpa [#allocation5 + $0x1], 1 }

</bundles_post_ra>
